<compile_context>
chip_gen: v7x
topology: tpu7x:2x2x1
jax: 0.10.0
libtpu: 0.0.40
codegen_flags: <defaults>
</compile_context>

<pallas_src>
import functools

import jax
import jax.numpy as jnp
from jax.experimental import pallas as pl
from jax.experimental.pallas import tpu as pltpu

LANE = 128          # TPU lane width; hidden / each gate / output are padded to one vreg width.
NEG = -1e30         # finite "minus infinity" for padded logit lanes (avoids inf arithmetic).


def _lstm_tagger_kernel(ids_ref,    # (S*B, 1) int32  time-major token ids (row = t*B + b)
                        xgt_ref,    # (Vp, 4*LANE)    fused per-vocab-row  emb @ W_ih^T + b
                        whh_ref,    # (LANE, 4*LANE)  packed W_hh^T, gate blocks lane-aligned
                        wfc_ref,    # (LANE, LANE)    padded FC weight
                        bfc_ref,    # (1, LANE)       padded FC bias (-1e30 in padded lanes)
                        out_ref):   # (B, S, LANE)    batch-first log-probs (lane-dense store)
    B, S, L = out_ref.shape
    Vp = xgt_ref.shape[0]
    R = S * B

    # ---- 1) one-hot(ids) @ xg_table: embedding lookup + input gate matmul + bias in one shot
    ids = ids_ref[...]                                               # (R, 1) int32
    onehot = (jax.lax.broadcasted_iota(jnp.int32, (R, Vp), 1) == ids).astype(jnp.float32)
    xg = jnp.dot(onehot, xgt_ref[...],
                 preferred_element_type=jnp.float32)                 # (R, 4L), time-major rows

    # ---- 2) LSTM recurrence, fully unrolled; h/c live in vregs, gate slices lane-aligned ----
    whh = whh_ref[...]
    h = jnp.zeros((B, L), jnp.float32)
    c = jnp.zeros((B, L), jnp.float32)
    hs = []
    for t in range(S):
        gates = xg[t * B:(t + 1) * B, :] + jnp.dot(h, whh,
                                                   preferred_element_type=jnp.float32)
        i = jax.nn.sigmoid(gates[:, 0 * L:1 * L])
        f = jax.nn.sigmoid(gates[:, 1 * L:2 * L])
        g = jnp.tanh(gates[:, 2 * L:3 * L])
        o = jax.nn.sigmoid(gates[:, 3 * L:4 * L])
        c = f * c + i * g               # padded lanes stay exactly 0 (g_pad = 0, c0_pad = 0)
        h = o * jnp.tanh(c)
        hs.append(h)

    # ---- 3) batched FC + log_softmax; hidden states never left vregs; one lane-dense store --
    hs_bf = jnp.stack(hs, axis=1).reshape(R, L)                      # (B*S, L), batch-major
    logits = jnp.dot(hs_bf, wfc_ref[...],
                     preferred_element_type=jnp.float32) + bfc_ref[...]
    m = jnp.max(logits, axis=-1, keepdims=True)
    shifted = logits - m
    lse = jnp.log(jnp.sum(jnp.exp(shifted), axis=-1, keepdims=True))
    out_ref[...] = (shifted - lse).reshape(B, S, L).astype(out_ref.dtype)


def _pack_gate_weight(w, hidden_dim):
    """(4H, H) PyTorch gate-stacked weight -> (LANE, 4*LANE) transposed; gate k's columns sit
    lane-aligned at k*LANE, unused rows/columns are zero."""
    H = hidden_dim
    wt = jnp.transpose(w).astype(jnp.float32)                 # (H, 4H)
    out = jnp.zeros((LANE, 4 * LANE), jnp.float32)
    for k in range(4):
        out = out.at[:H, k * LANE:k * LANE + H].set(wt[:, k * H:(k + 1) * H])
    return out


def _pack_gate_bias(b, hidden_dim):
    H = hidden_dim
    out = jnp.zeros((1, 4 * LANE), jnp.float32)
    for k in range(4):
        out = out.at[0, k * LANE:k * LANE + H].set(b[k * H:(k + 1) * H])
    return out


def lstm_tagger_forward(x_ids, params):
    """x_ids: (B, S) int32 token ids.  Returns (B, S, O) float32 log-probs (batch_first)."""
    emb_table = params["embedding"]          # (V, H)
    V, H = emb_table.shape
    O = params["w_fc"].shape[0]
    B, S = x_ids.shape
    assert H <= LANE and O <= LANE, "toy kernel pads H and O up to a single 128-lane vreg"

    Vp = max(8, ((V + 7) // 8) * 8)          # sublane-align the vocab axis

    # One-time parameter packing (tiny XLA glue; constant-folded when params are jit consts).
    wih_p = _pack_gate_weight(params["w_ih"], H)
    whh_p = _pack_gate_weight(params["w_hh"], H)
    b_p = _pack_gate_bias(params["b_ih"] + params["b_hh"], H)
    emb_p = jnp.zeros((Vp, LANE), jnp.float32).at[:V, :H].set(emb_table)
    # Fused xg table: row v = emb[v] @ W_ih^T + (b_ih + b_hh), gate blocks lane-aligned,
    # padded vocab rows zeroed (a valid id never selects them anyway).
    xg_tab = (emb_p @ wih_p + b_p).at[V:, :].set(0.0)          # (Vp, 4*LANE), ~32 KiB
    wfc_p = jnp.zeros((LANE, LANE), jnp.float32).at[:H, :O].set(jnp.transpose(params["w_fc"]))
    bfc_p = jnp.full((1, LANE), NEG, jnp.float32).at[0, :O].set(params["b_fc"])

    # Time-major id vector (row = t*B + b) so per-step xg slices in the kernel are contiguous.
    # Out-of-range ids are safe (all-zero one-hot row), unlike the old dynamic VMEM gather.
    ids_tm = jnp.transpose(x_ids.astype(jnp.int32)).reshape(S * B, 1)

    # Total resident VMEM is well under 1 MiB, so no tiling / Buffered(1) tricks are needed.
    out_padded = pl.pallas_call(
        _lstm_tagger_kernel,
        out_shape=jax.ShapeDtypeStruct((B, S, LANE), jnp.float32),
        grid_spec=pltpu.PrefetchScalarGridSpec(
            num_scalar_prefetch=0,
            grid=(1,),                             # whole sequence handled in one invocation
            in_specs=[
                pl.BlockSpec((S * B, 1), lambda i: (0, 0)),             # time-major ids
                pl.BlockSpec((Vp, 4 * LANE), lambda i: (0, 0)),         # fused xg table
                pl.BlockSpec((LANE, 4 * LANE), lambda i: (0, 0)),       # packed W_hh^T
                pl.BlockSpec((LANE, LANE), lambda i: (0, 0)),           # packed W_fc^T
                pl.BlockSpec((1, LANE), lambda i: (0, 0)),              # packed fc bias
            ],
            out_specs=pl.BlockSpec((B, S, LANE), lambda i: (0, 0, 0)),
        ),
        compiler_params=pltpu.CompilerParams(
            dimension_semantics=("arbitrary",),
        ),
    )(ids_tm, xg_tab, whh_p, wfc_p, bfc_p)

    return out_padded[:, :, :O]                    # strip lane padding -> (B, S, O)


def _reference_forward(x_ids, params):
    """Pure-JAX reference of the PyTorch forward (for a correctness check)."""
    emb = jnp.take(params["embedding"], x_ids, axis=0)         # (B, S, H)
    H = params["embedding"].shape[1]
    w_ih, w_hh = params["w_ih"], params["w_hh"]
    b = params["b_ih"] + params["b_hh"]

    def step(carry, x_t):
        h, c = carry
        gates = x_t @ w_ih.T + h @ w_hh.T + b
        i = jax.nn.sigmoid(gates[:, 0 * H:1 * H])
        f = jax.nn.sigmoid(gates[:, 1 * H:2 * H])
        g = jnp.tanh(gates[:, 2 * H:3 * H])
        o = jax.nn.sigmoid(gates[:, 3 * H:4 * H])
        c = f * c + i * g
        h = o * jnp.tanh(c)
        return (h, c), h

    B = x_ids.shape[0]
    h0 = jnp.zeros((B, H), jnp.float32)
    c0 = jnp.zeros((B, H), jnp.float32)
    _, hs = jax.lax.scan(step, (h0, c0), jnp.transpose(emb, (1, 0, 2)))
    lstm_out = jnp.transpose(hs, (1, 0, 2))                    # (B, S, H)
    tag_space = lstm_out @ params["w_fc"].T + params["b_fc"]
    return jax.nn.log_softmax(tag_space, axis=2)


def make_params(key, input_dim, hidden_dim, output_dim):
    """Deterministic synthetic parameters matching the PyTorch module's shapes."""
    ks = jax.random.split(key, 7)
    s = 1.0 / jnp.sqrt(hidden_dim)
    return {
        "embedding": jax.random.normal(ks[0], (input_dim, hidden_dim), jnp.float32),
        "w_ih": jax.random.uniform(ks[1], (4 * hidden_dim, hidden_dim), jnp.float32, -s, s),
        "w_hh": jax.random.uniform(ks[2], (4 * hidden_dim, hidden_dim), jnp.float32, -s, s),
        "b_ih": jax.random.uniform(ks[3], (4 * hidden_dim,), jnp.float32, -s, s),
        "b_hh": jax.random.uniform(ks[4], (4 * hidden_dim,), jnp.float32, -s, s),
        "w_fc": jax.random.uniform(ks[5], (output_dim, hidden_dim), jnp.float32, -s, s),
        "b_fc": jax.random.uniform(ks[6], (output_dim,), jnp.float32, -s, s),
    }


if __name__ == "__main__":
    INPUT_DIM = 16    # vocab size
    HIDDEN_DIM = 32
    OUTPUT_DIM = 8
    BATCH = 2
    SEQ = 8

    key = jax.random.PRNGKey(0)
    k_param, k_data = jax.random.split(key)
    params = make_params(k_param, INPUT_DIM, HIDDEN_DIM, OUTPUT_DIM)
    x_ids = jax.random.randint(k_data, (BATCH, SEQ), 0, INPUT_DIM, dtype=jnp.int32)

    out = jax.jit(functools.partial(lstm_tagger_forward, params=params))(x_ids)
    out = jax.block_until_ready(out)

    ref = _reference_forward(x_ids, params)
    assert out.shape == (BATCH, SEQ, OUTPUT_DIM)
    assert jnp.allclose(out, ref, atol=1e-5, rtol=1e-5)

    print("KERNEL_OK")
</pallas_src>

<mosaic_0001>
module attributes {stable_mosaic.version = 11 : i64} {
  func.func @_lstm_tagger_kernel(%arg0: i32, %arg1: memref<16x1xi32, #tpu.memory_space<vmem>>, %arg2: memref<16x512xf32, #tpu.memory_space<vmem>>, %arg3: memref<128x512xf32, #tpu.memory_space<vmem>>, %arg4: memref<128x128xf32, #tpu.memory_space<vmem>>, %arg5: memref<1x128xf32, #tpu.memory_space<vmem>>, %arg6: memref<2x8x128xf32, #tpu.memory_space<vmem>>) attributes {dimension_semantics = [#tpu.dimension_semantics<arbitrary>], iteration_bounds = array<i64: 1>, scalar_prefetch = 0 : i64, scratch_operands = 0 : i64, tpu.core_type = #tpu.core_type<tc>, window_params = [{pipeline_mode = #tpu.pipeline_mode<synchronous>, transform_indices = @transform_0, window_bounds = array<i64: 16, 1>}, {pipeline_mode = #tpu.pipeline_mode<synchronous>, transform_indices = @transform_1, window_bounds = array<i64: 16, 512>}, {pipeline_mode = #tpu.pipeline_mode<synchronous>, transform_indices = @transform_2, window_bounds = array<i64: 128, 512>}, {pipeline_mode = #tpu.pipeline_mode<synchronous>, transform_indices = @transform_3, window_bounds = array<i64: 128, 128>}, {pipeline_mode = #tpu.pipeline_mode<synchronous>, transform_indices = @transform_4, window_bounds = array<i64: 1, 128>}, {pipeline_mode = #tpu.pipeline_mode<synchronous>, transform_indices = @transform_5, window_bounds = array<i64: 2, 8, 128>}]} {
    %c0 = arith.constant 0 : index
    %c0_0 = arith.constant 0 : index
    %0 = vector.load %arg1[%c0, %c0_0] : memref<16x1xi32, #tpu.memory_space<vmem>>, vector<16x1xi32>
    %1 = tpu.iota {dimensions = array<i32: 1>} : vector<16x16xi32>
    %2 = vector.broadcast %0 : vector<16x1xi32> to vector<16x16xi32>
    %3 = arith.cmpi eq, %1, %2 : vector<16x16xi32>
    %4 = arith.extui %3 : vector<16x16xi1> to vector<16x16xi32>
    %5 = arith.sitofp %4 : vector<16x16xi32> to vector<16x16xf32>
    %c0_1 = arith.constant 0 : index
    %c0_2 = arith.constant 0 : index
    %6 = vector.load %arg2[%c0_1, %c0_2] : memref<16x512xf32, #tpu.memory_space<vmem>>, vector<16x512xf32>
    %cst = arith.constant dense<0.000000e+00> : vector<16x512xf32>
    %7 = tpu.matmul %5, %6, %cst {dimension_numbers = #tpu.dot_dimension_numbers<[1], [0], [0], [1], [0, 0, 1, 1], [], []>} : vector<16x16xf32>, vector<16x512xf32>, vector<16x512xf32> -> vector<16x512xf32>
    %c0_3 = arith.constant 0 : index
    %c0_4 = arith.constant 0 : index
    %8 = vector.load %arg3[%c0_3, %c0_4] : memref<128x512xf32, #tpu.memory_space<vmem>>, vector<128x512xf32>
    %cst_5 = arith.constant 0.000000e+00 : f32
    %9 = vector.broadcast %cst_5 : f32 to vector<2x128xf32>
    %cst_6 = arith.constant 0.000000e+00 : f32
    %10 = vector.broadcast %cst_6 : f32 to vector<2x128xf32>
    %11 = vector.extract_strided_slice %7 {offsets = [0, 0], sizes = [2, 512], strides = [1, 1]} : vector<16x512xf32> to vector<2x512xf32>
    %cst_7 = arith.constant dense<0.000000e+00> : vector<2x512xf32>
    %12 = tpu.matmul %9, %8, %cst_7 {dimension_numbers = #tpu.dot_dimension_numbers<[1], [0], [0], [1], [0, 0, 1, 1], [], []>} : vector<2x128xf32>, vector<128x512xf32>, vector<2x512xf32> -> vector<2x512xf32>
    %13 = arith.addf %11, %12 : vector<2x512xf32>
    %14 = vector.extract_strided_slice %13 {offsets = [0, 0], sizes = [2, 128], strides = [1, 1]} : vector<2x512xf32> to vector<2x128xf32>
    %15 = arith.negf %14 : vector<2x128xf32>
    %16 = math.exp %15 : vector<2x128xf32>
    %cst_8 = arith.constant 1.000000e+00 : f32
    %17 = vector.broadcast %cst_8 : f32 to vector<2x128xf32>
    %18 = arith.addf %17, %16 : vector<2x128xf32>
    %19 = arith.divf %17, %18 : vector<2x128xf32>
    %20 = vector.extract_strided_slice %13 {offsets = [0, 128], sizes = [2, 128], strides = [1, 1]} : vector<2x512xf32> to vector<2x128xf32>
    %21 = arith.negf %20 : vector<2x128xf32>
    %22 = math.exp %21 : vector<2x128xf32>
    %cst_9 = arith.constant 1.000000e+00 : f32
    %23 = vector.broadcast %cst_9 : f32 to vector<2x128xf32>
    %24 = arith.addf %23, %22 : vector<2x128xf32>
    %25 = arith.divf %23, %24 : vector<2x128xf32>
    %26 = vector.extract_strided_slice %13 {offsets = [0, 256], sizes = [2, 128], strides = [1, 1]} : vector<2x512xf32> to vector<2x128xf32>
    %27 = math.tanh %26 : vector<2x128xf32>
    %28 = vector.extract_strided_slice %13 {offsets = [0, 384], sizes = [2, 128], strides = [1, 1]} : vector<2x512xf32> to vector<2x128xf32>
    %29 = arith.negf %28 : vector<2x128xf32>
    %30 = math.exp %29 : vector<2x128xf32>
    %cst_10 = arith.constant 1.000000e+00 : f32
    %31 = vector.broadcast %cst_10 : f32 to vector<2x128xf32>
    %32 = arith.addf %31, %30 : vector<2x128xf32>
    %33 = arith.divf %31, %32 : vector<2x128xf32>
    %34 = arith.mulf %25, %10 : vector<2x128xf32>
    %35 = arith.mulf %19, %27 : vector<2x128xf32>
    %36 = arith.addf %34, %35 : vector<2x128xf32>
    %37 = math.tanh %36 : vector<2x128xf32>
    %38 = arith.mulf %33, %37 : vector<2x128xf32>
    %39 = vector.extract_strided_slice %7 {offsets = [2, 0], sizes = [2, 512], strides = [1, 1]} : vector<16x512xf32> to vector<2x512xf32>
    %cst_11 = arith.constant dense<0.000000e+00> : vector<2x512xf32>
    %40 = tpu.matmul %38, %8, %cst_11 {dimension_numbers = #tpu.dot_dimension_numbers<[1], [0], [0], [1], [0, 0, 1, 1], [], []>} : vector<2x128xf32>, vector<128x512xf32>, vector<2x512xf32> -> vector<2x512xf32>
    %41 = arith.addf %39, %40 : vector<2x512xf32>
    %42 = vector.extract_strided_slice %41 {offsets = [0, 0], sizes = [2, 128], strides = [1, 1]} : vector<2x512xf32> to vector<2x128xf32>
    %43 = arith.negf %42 : vector<2x128xf32>
    %44 = math.exp %43 : vector<2x128xf32>
    %cst_12 = arith.constant 1.000000e+00 : f32
    %45 = vector.broadcast %cst_12 : f32 to vector<2x128xf32>
    %46 = arith.addf %45, %44 : vector<2x128xf32>
    %47 = arith.divf %45, %46 : vector<2x128xf32>
    %48 = vector.extract_strided_slice %41 {offsets = [0, 128], sizes = [2, 128], strides = [1, 1]} : vector<2x512xf32> to vector<2x128xf32>
    %49 = arith.negf %48 : vector<2x128xf32>
    %50 = math.exp %49 : vector<2x128xf32>
    %cst_13 = arith.constant 1.000000e+00 : f32
    %51 = vector.broadcast %cst_13 : f32 to vector<2x128xf32>
    %52 = arith.addf %51, %50 : vector<2x128xf32>
    %53 = arith.divf %51, %52 : vector<2x128xf32>
    %54 = vector.extract_strided_slice %41 {offsets = [0, 256], sizes = [2, 128], strides = [1, 1]} : vector<2x512xf32> to vector<2x128xf32>
    %55 = math.tanh %54 : vector<2x128xf32>
    %56 = vector.extract_strided_slice %41 {offsets = [0, 384], sizes = [2, 128], strides = [1, 1]} : vector<2x512xf32> to vector<2x128xf32>
    %57 = arith.negf %56 : vector<2x128xf32>
    %58 = math.exp %57 : vector<2x128xf32>
    %cst_14 = arith.constant 1.000000e+00 : f32
    %59 = vector.broadcast %cst_14 : f32 to vector<2x128xf32>
    %60 = arith.addf %59, %58 : vector<2x128xf32>
    %61 = arith.divf %59, %60 : vector<2x128xf32>
    %62 = arith.mulf %53, %36 : vector<2x128xf32>
    %63 = arith.mulf %47, %55 : vector<2x128xf32>
    %64 = arith.addf %62, %63 : vector<2x128xf32>
    %65 = math.tanh %64 : vector<2x128xf32>
    %66 = arith.mulf %61, %65 : vector<2x128xf32>
    %67 = vector.extract_strided_slice %7 {offsets = [4, 0], sizes = [2, 512], strides = [1, 1]} : vector<16x512xf32> to vector<2x512xf32>
    %cst_15 = arith.constant dense<0.000000e+00> : vector<2x512xf32>
    %68 = tpu.matmul %66, %8, %cst_15 {dimension_numbers = #tpu.dot_dimension_numbers<[1], [0], [0], [1], [0, 0, 1, 1], [], []>} : vector<2x128xf32>, vector<128x512xf32>, vector<2x512xf32> -> vector<2x512xf32>
    %69 = arith.addf %67, %68 : vector<2x512xf32>
    %70 = vector.extract_strided_slice %69 {offsets = [0, 0], sizes = [2, 128], strides = [1, 1]} : vector<2x512xf32> to vector<2x128xf32>
    %71 = arith.negf %70 : vector<2x128xf32>
    %72 = math.exp %71 : vector<2x128xf32>
    %cst_16 = arith.constant 1.000000e+00 : f32
    %73 = vector.broadcast %cst_16 : f32 to vector<2x128xf32>
    %74 = arith.addf %73, %72 : vector<2x128xf32>
    %75 = arith.divf %73, %74 : vector<2x128xf32>
    %76 = vector.extract_strided_slice %69 {offsets = [0, 128], sizes = [2, 128], strides = [1, 1]} : vector<2x512xf32> to vector<2x128xf32>
    %77 = arith.negf %76 : vector<2x128xf32>
    %78 = math.exp %77 : vector<2x128xf32>
    %cst_17 = arith.constant 1.000000e+00 : f32
    %79 = vector.broadcast %cst_17 : f32 to vector<2x128xf32>
    %80 = arith.addf %79, %78 : vector<2x128xf32>
    %81 = arith.divf %79, %80 : vector<2x128xf32>
    %82 = vector.extract_strided_slice %69 {offsets = [0, 256], sizes = [2, 128], strides = [1, 1]} : vector<2x512xf32> to vector<2x128xf32>
    %83 = math.tanh %82 : vector<2x128xf32>
    %84 = vector.extract_strided_slice %69 {offsets = [0, 384], sizes = [2, 128], strides = [1, 1]} : vector<2x512xf32> to vector<2x128xf32>
    %85 = arith.negf %84 : vector<2x128xf32>
    %86 = math.exp %85 : vector<2x128xf32>
    %cst_18 = arith.constant 1.000000e+00 : f32
    %87 = vector.broadcast %cst_18 : f32 to vector<2x128xf32>
    %88 = arith.addf %87, %86 : vector<2x128xf32>
    %89 = arith.divf %87, %88 : vector<2x128xf32>
    %90 = arith.mulf %81, %64 : vector<2x128xf32>
    %91 = arith.mulf %75, %83 : vector<2x128xf32>
    %92 = arith.addf %90, %91 : vector<2x128xf32>
    %93 = math.tanh %92 : vector<2x128xf32>
    %94 = arith.mulf %89, %93 : vector<2x128xf32>
    %95 = vector.extract_strided_slice %7 {offsets = [6, 0], sizes = [2, 512], strides = [1, 1]} : vector<16x512xf32> to vector<2x512xf32>
    %cst_19 = arith.constant dense<0.000000e+00> : vector<2x512xf32>
    %96 = tpu.matmul %94, %8, %cst_19 {dimension_numbers = #tpu.dot_dimension_numbers<[1], [0], [0], [1], [0, 0, 1, 1], [], []>} : vector<2x128xf32>, vector<128x512xf32>, vector<2x512xf32> -> vector<2x512xf32>
    %97 = arith.addf %95, %96 : vector<2x512xf32>
    %98 = vector.extract_strided_slice %97 {offsets = [0, 0], sizes = [2, 128], strides = [1, 1]} : vector<2x512xf32> to vector<2x128xf32>
    %99 = arith.negf %98 : vector<2x128xf32>
    %100 = math.exp %99 : vector<2x128xf32>
    %cst_20 = arith.constant 1.000000e+00 : f32
    %101 = vector.broadcast %cst_20 : f32 to vector<2x128xf32>
    %102 = arith.addf %101, %100 : vector<2x128xf32>
    %103 = arith.divf %101, %102 : vector<2x128xf32>
    %104 = vector.extract_strided_slice %97 {offsets = [0, 128], sizes = [2, 128], strides = [1, 1]} : vector<2x512xf32> to vector<2x128xf32>
    %105 = arith.negf %104 : vector<2x128xf32>
    %106 = math.exp %105 : vector<2x128xf32>
    %cst_21 = arith.constant 1.000000e+00 : f32
    %107 = vector.broadcast %cst_21 : f32 to vector<2x128xf32>
    %108 = arith.addf %107, %106 : vector<2x128xf32>
    %109 = arith.divf %107, %108 : vector<2x128xf32>
    %110 = vector.extract_strided_slice %97 {offsets = [0, 256], sizes = [2, 128], strides = [1, 1]} : vector<2x512xf32> to vector<2x128xf32>
    %111 = math.tanh %110 : vector<2x128xf32>
    %112 = vector.extract_strided_slice %97 {offsets = [0, 384], sizes = [2, 128], strides = [1, 1]} : vector<2x512xf32> to vector<2x128xf32>
    %113 = arith.negf %112 : vector<2x128xf32>
    %114 = math.exp %113 : vector<2x128xf32>
    %cst_22 = arith.constant 1.000000e+00 : f32
    %115 = vector.broadcast %cst_22 : f32 to vector<2x128xf32>
    %116 = arith.addf %115, %114 : vector<2x128xf32>
    %117 = arith.divf %115, %116 : vector<2x128xf32>
    %118 = arith.mulf %109, %92 : vector<2x128xf32>
    %119 = arith.mulf %103, %111 : vector<2x128xf32>
    %120 = arith.addf %118, %119 : vector<2x128xf32>
    %121 = math.tanh %120 : vector<2x128xf32>
    %122 = arith.mulf %117, %121 : vector<2x128xf32>
    %123 = vector.extract_strided_slice %7 {offsets = [8, 0], sizes = [2, 512], strides = [1, 1]} : vector<16x512xf32> to vector<2x512xf32>
    %cst_23 = arith.constant dense<0.000000e+00> : vector<2x512xf32>
    %124 = tpu.matmul %122, %8, %cst_23 {dimension_numbers = #tpu.dot_dimension_numbers<[1], [0], [0], [1], [0, 0, 1, 1], [], []>} : vector<2x128xf32>, vector<128x512xf32>, vector<2x512xf32> -> vector<2x512xf32>
    %125 = arith.addf %123, %124 : vector<2x512xf32>
    %126 = vector.extract_strided_slice %125 {offsets = [0, 0], sizes = [2, 128], strides = [1, 1]} : vector<2x512xf32> to vector<2x128xf32>
    %127 = arith.negf %126 : vector<2x128xf32>
    %128 = math.exp %127 : vector<2x128xf32>
    %cst_24 = arith.constant 1.000000e+00 : f32
    %129 = vector.broadcast %cst_24 : f32 to vector<2x128xf32>
    %130 = arith.addf %129, %128 : vector<2x128xf32>
    %131 = arith.divf %129, %130 : vector<2x128xf32>
    %132 = vector.extract_strided_slice %125 {offsets = [0, 128], sizes = [2, 128], strides = [1, 1]} : vector<2x512xf32> to vector<2x128xf32>
    %133 = arith.negf %132 : vector<2x128xf32>
    %134 = math.exp %133 : vector<2x128xf32>
    %cst_25 = arith.constant 1.000000e+00 : f32
    %135 = vector.broadcast %cst_25 : f32 to vector<2x128xf32>
    %136 = arith.addf %135, %134 : vector<2x128xf32>
    %137 = arith.divf %135, %136 : vector<2x128xf32>
    %138 = vector.extract_strided_slice %125 {offsets = [0, 256], sizes = [2, 128], strides = [1, 1]} : vector<2x512xf32> to vector<2x128xf32>
    %139 = math.tanh %138 : vector<2x128xf32>
    %140 = vector.extract_strided_slice %125 {offsets = [0, 384], sizes = [2, 128], strides = [1, 1]} : vector<2x512xf32> to vector<2x128xf32>
    %141 = arith.negf %140 : vector<2x128xf32>
    %142 = math.exp %141 : vector<2x128xf32>
    %cst_26 = arith.constant 1.000000e+00 : f32
    %143 = vector.broadcast %cst_26 : f32 to vector<2x128xf32>
    %144 = arith.addf %143, %142 : vector<2x128xf32>
    %145 = arith.divf %143, %144 : vector<2x128xf32>
    %146 = arith.mulf %137, %120 : vector<2x128xf32>
    %147 = arith.mulf %131, %139 : vector<2x128xf32>
    %148 = arith.addf %146, %147 : vector<2x128xf32>
    %149 = math.tanh %148 : vector<2x128xf32>
    %150 = arith.mulf %145, %149 : vector<2x128xf32>
    %151 = vector.extract_strided_slice %7 {offsets = [10, 0], sizes = [2, 512], strides = [1, 1]} : vector<16x512xf32> to vector<2x512xf32>
    %cst_27 = arith.constant dense<0.000000e+00> : vector<2x512xf32>
    %152 = tpu.matmul %150, %8, %cst_27 {dimension_numbers = #tpu.dot_dimension_numbers<[1], [0], [0], [1], [0, 0, 1, 1], [], []>} : vector<2x128xf32>, vector<128x512xf32>, vector<2x512xf32> -> vector<2x512xf32>
    %153 = arith.addf %151, %152 : vector<2x512xf32>
    %154 = vector.extract_strided_slice %153 {offsets = [0, 0], sizes = [2, 128], strides = [1, 1]} : vector<2x512xf32> to vector<2x128xf32>
    %155 = arith.negf %154 : vector<2x128xf32>
    %156 = math.exp %155 : vector<2x128xf32>
    %cst_28 = arith.constant 1.000000e+00 : f32
    %157 = vector.broadcast %cst_28 : f32 to vector<2x128xf32>
    %158 = arith.addf %157, %156 : vector<2x128xf32>
    %159 = arith.divf %157, %158 : vector<2x128xf32>
    %160 = vector.extract_strided_slice %153 {offsets = [0, 128], sizes = [2, 128], strides = [1, 1]} : vector<2x512xf32> to vector<2x128xf32>
    %161 = arith.negf %160 : vector<2x128xf32>
    %162 = math.exp %161 : vector<2x128xf32>
    %cst_29 = arith.constant 1.000000e+00 : f32
    %163 = vector.broadcast %cst_29 : f32 to vector<2x128xf32>
    %164 = arith.addf %163, %162 : vector<2x128xf32>
    %165 = arith.divf %163, %164 : vector<2x128xf32>
    %166 = vector.extract_strided_slice %153 {offsets = [0, 256], sizes = [2, 128], strides = [1, 1]} : vector<2x512xf32> to vector<2x128xf32>
    %167 = math.tanh %166 : vector<2x128xf32>
    %168 = vector.extract_strided_slice %153 {offsets = [0, 384], sizes = [2, 128], strides = [1, 1]} : vector<2x512xf32> to vector<2x128xf32>
    %169 = arith.negf %168 : vector<2x128xf32>
    %170 = math.exp %169 : vector<2x128xf32>
    %cst_30 = arith.constant 1.000000e+00 : f32
    %171 = vector.broadcast %cst_30 : f32 to vector<2x128xf32>
    %172 = arith.addf %171, %170 : vector<2x128xf32>
    %173 = arith.divf %171, %172 : vector<2x128xf32>
    %174 = arith.mulf %165, %148 : vector<2x128xf32>
    %175 = arith.mulf %159, %167 : vector<2x128xf32>
    %176 = arith.addf %174, %175 : vector<2x128xf32>
    %177 = math.tanh %176 : vector<2x128xf32>
    %178 = arith.mulf %173, %177 : vector<2x128xf32>
    %179 = vector.extract_strided_slice %7 {offsets = [12, 0], sizes = [2, 512], strides = [1, 1]} : vector<16x512xf32> to vector<2x512xf32>
    %cst_31 = arith.constant dense<0.000000e+00> : vector<2x512xf32>
    %180 = tpu.matmul %178, %8, %cst_31 {dimension_numbers = #tpu.dot_dimension_numbers<[1], [0], [0], [1], [0, 0, 1, 1], [], []>} : vector<2x128xf32>, vector<128x512xf32>, vector<2x512xf32> -> vector<2x512xf32>
    %181 = arith.addf %179, %180 : vector<2x512xf32>
    %182 = vector.extract_strided_slice %181 {offsets = [0, 0], sizes = [2, 128], strides = [1, 1]} : vector<2x512xf32> to vector<2x128xf32>
    %183 = arith.negf %182 : vector<2x128xf32>
    %184 = math.exp %183 : vector<2x128xf32>
    %cst_32 = arith.constant 1.000000e+00 : f32
    %185 = vector.broadcast %cst_32 : f32 to vector<2x128xf32>
    %186 = arith.addf %185, %184 : vector<2x128xf32>
    %187 = arith.divf %185, %186 : vector<2x128xf32>
    %188 = vector.extract_strided_slice %181 {offsets = [0, 128], sizes = [2, 128], strides = [1, 1]} : vector<2x512xf32> to vector<2x128xf32>
    %189 = arith.negf %188 : vector<2x128xf32>
    %190 = math.exp %189 : vector<2x128xf32>
    %cst_33 = arith.constant 1.000000e+00 : f32
    %191 = vector.broadcast %cst_33 : f32 to vector<2x128xf32>
    %192 = arith.addf %191, %190 : vector<2x128xf32>
    %193 = arith.divf %191, %192 : vector<2x128xf32>
    %194 = vector.extract_strided_slice %181 {offsets = [0, 256], sizes = [2, 128], strides = [1, 1]} : vector<2x512xf32> to vector<2x128xf32>
    %195 = math.tanh %194 : vector<2x128xf32>
    %196 = vector.extract_strided_slice %181 {offsets = [0, 384], sizes = [2, 128], strides = [1, 1]} : vector<2x512xf32> to vector<2x128xf32>
    %197 = arith.negf %196 : vector<2x128xf32>
    %198 = math.exp %197 : vector<2x128xf32>
    %cst_34 = arith.constant 1.000000e+00 : f32
    %199 = vector.broadcast %cst_34 : f32 to vector<2x128xf32>
    %200 = arith.addf %199, %198 : vector<2x128xf32>
    %201 = arith.divf %199, %200 : vector<2x128xf32>
    %202 = arith.mulf %193, %176 : vector<2x128xf32>
    %203 = arith.mulf %187, %195 : vector<2x128xf32>
    %204 = arith.addf %202, %203 : vector<2x128xf32>
    %205 = math.tanh %204 : vector<2x128xf32>
    %206 = arith.mulf %201, %205 : vector<2x128xf32>
    %207 = vector.extract_strided_slice %7 {offsets = [14, 0], sizes = [2, 512], strides = [1, 1]} : vector<16x512xf32> to vector<2x512xf32>
    %cst_35 = arith.constant dense<0.000000e+00> : vector<2x512xf32>
    %208 = tpu.matmul %206, %8, %cst_35 {dimension_numbers = #tpu.dot_dimension_numbers<[1], [0], [0], [1], [0, 0, 1, 1], [], []>} : vector<2x128xf32>, vector<128x512xf32>, vector<2x512xf32> -> vector<2x512xf32>
    %209 = arith.addf %207, %208 : vector<2x512xf32>
    %210 = vector.extract_strided_slice %209 {offsets = [0, 0], sizes = [2, 128], strides = [1, 1]} : vector<2x512xf32> to vector<2x128xf32>
    %211 = arith.negf %210 : vector<2x128xf32>
    %212 = math.exp %211 : vector<2x128xf32>
    %cst_36 = arith.constant 1.000000e+00 : f32
    %213 = vector.broadcast %cst_36 : f32 to vector<2x128xf32>
    %214 = arith.addf %213, %212 : vector<2x128xf32>
    %215 = arith.divf %213, %214 : vector<2x128xf32>
    %216 = vector.extract_strided_slice %209 {offsets = [0, 128], sizes = [2, 128], strides = [1, 1]} : vector<2x512xf32> to vector<2x128xf32>
    %217 = arith.negf %216 : vector<2x128xf32>
    %218 = math.exp %217 : vector<2x128xf32>
    %cst_37 = arith.constant 1.000000e+00 : f32
    %219 = vector.broadcast %cst_37 : f32 to vector<2x128xf32>
    %220 = arith.addf %219, %218 : vector<2x128xf32>
    %221 = arith.divf %219, %220 : vector<2x128xf32>
    %222 = vector.extract_strided_slice %209 {offsets = [0, 256], sizes = [2, 128], strides = [1, 1]} : vector<2x512xf32> to vector<2x128xf32>
    %223 = math.tanh %222 : vector<2x128xf32>
    %224 = vector.extract_strided_slice %209 {offsets = [0, 384], sizes = [2, 128], strides = [1, 1]} : vector<2x512xf32> to vector<2x128xf32>
    %225 = arith.negf %224 : vector<2x128xf32>
    %226 = math.exp %225 : vector<2x128xf32>
    %cst_38 = arith.constant 1.000000e+00 : f32
    %227 = vector.broadcast %cst_38 : f32 to vector<2x128xf32>
    %228 = arith.addf %227, %226 : vector<2x128xf32>
    %229 = arith.divf %227, %228 : vector<2x128xf32>
    %230 = arith.mulf %221, %204 : vector<2x128xf32>
    %231 = arith.mulf %215, %223 : vector<2x128xf32>
    %232 = arith.addf %230, %231 : vector<2x128xf32>
    %233 = math.tanh %232 : vector<2x128xf32>
    %234 = arith.mulf %229, %233 : vector<2x128xf32>
    %235 = vector.shape_cast %38 : vector<2x128xf32> to vector<2x1x128xf32>
    %236 = vector.shape_cast %66 : vector<2x128xf32> to vector<2x1x128xf32>
    %237 = vector.shape_cast %94 : vector<2x128xf32> to vector<2x1x128xf32>
    %238 = vector.shape_cast %122 : vector<2x128xf32> to vector<2x1x128xf32>
    %239 = vector.shape_cast %150 : vector<2x128xf32> to vector<2x1x128xf32>
    %240 = vector.shape_cast %178 : vector<2x128xf32> to vector<2x1x128xf32>
    %241 = vector.shape_cast %206 : vector<2x128xf32> to vector<2x1x128xf32>
    %242 = vector.shape_cast %234 : vector<2x128xf32> to vector<2x1x128xf32>
    %243 = tpu.concatenate %235, %236, %237, %238, %239, %240, %241, %242 in 1 : vector<2x1x128xf32>, vector<2x1x128xf32>, vector<2x1x128xf32>, vector<2x1x128xf32>, vector<2x1x128xf32>, vector<2x1x128xf32>, vector<2x1x128xf32>, vector<2x1x128xf32> -> vector<2x8x128xf32>
    %244 = vector.shape_cast %243 : vector<2x8x128xf32> to vector<16x128xf32>
    %c0_39 = arith.constant 0 : index
    %c0_40 = arith.constant 0 : index
    %245 = vector.load %arg4[%c0_39, %c0_40] : memref<128x128xf32, #tpu.memory_space<vmem>>, vector<128x128xf32>
    %cst_41 = arith.constant dense<0.000000e+00> : vector<16x128xf32>
    %246 = tpu.matmul %244, %245, %cst_41 {dimension_numbers = #tpu.dot_dimension_numbers<[1], [0], [0], [1], [0, 0, 1, 1], [], []>} : vector<16x128xf32>, vector<128x128xf32>, vector<16x128xf32> -> vector<16x128xf32>
    %c0_42 = arith.constant 0 : index
    %c0_43 = arith.constant 0 : index
    %247 = vector.load %arg5[%c0_42, %c0_43] : memref<1x128xf32, #tpu.memory_space<vmem>>, vector<1x128xf32>
    %248 = vector.broadcast %247 : vector<1x128xf32> to vector<16x128xf32>
    %249 = arith.addf %246, %248 : vector<16x128xf32>
    %cst_44 = arith.constant dense<0xFF800000> : vector<16xf32>
    %250 = vector.multi_reduction <maximumf>, %249, %cst_44 [1] : vector<16x128xf32> to vector<16xf32>
    %251 = vector.shape_cast %250 : vector<16xf32> to vector<16x1xf32>
    %252 = vector.broadcast %251 : vector<16x1xf32> to vector<16x128xf32>
    %253 = arith.subf %249, %252 : vector<16x128xf32>
    %254 = math.exp %253 : vector<16x128xf32>
    %cst_45 = arith.constant dense<0.000000e+00> : vector<16xf32>
    %255 = vector.multi_reduction <add>, %254, %cst_45 [1] : vector<16x128xf32> to vector<16xf32>
    %256 = vector.shape_cast %255 : vector<16xf32> to vector<16x1xf32>
    %257 = math.log %256 : vector<16x1xf32>
    %258 = vector.broadcast %257 : vector<16x1xf32> to vector<16x128xf32>
    %259 = arith.subf %253, %258 : vector<16x128xf32>
    %260 = vector.shape_cast %259 : vector<16x128xf32> to vector<2x8x128xf32>
    %c0_46 = arith.constant 0 : index
    %c0_47 = arith.constant 0 : index
    %c0_48 = arith.constant 0 : index
    %261 = vector.load %arg6[%c0_46, %c0_47, %c0_48] : memref<2x8x128xf32, #tpu.memory_space<vmem>>, vector<2x8x128xf32>
    tpu.vector_store %arg6[%c0_46, %c0_47, %c0_48], %260 {strides = array<i32>} : memref<2x8x128xf32, #tpu.memory_space<vmem>>, vector<2x8x128xf32>,
    return
  }
  func.func @transform_0(%arg0: i32) -> (i32, i32) {
    %c0_i32 = arith.constant 0 : i32
    %c0_i32_0 = arith.constant 0 : i32
    %c0_i32_1 = arith.constant 0 : i32
    return %c0_i32, %c0_i32_0 : i32, i32
  }
  func.func @transform_1(%arg0: i32) -> (i32, i32) {
    %c0_i32 = arith.constant 0 : i32
    %c0_i32_0 = arith.constant 0 : i32
    %c0_i32_1 = arith.constant 0 : i32
    return %c0_i32, %c0_i32_0 : i32, i32
  }
  func.func @transform_2(%arg0: i32) -> (i32, i32) {
    %c0_i32 = arith.constant 0 : i32
    %c0_i32_0 = arith.constant 0 : i32
    %c0_i32_1 = arith.constant 0 : i32
    return %c0_i32, %c0_i32_0 : i32, i32
  }
  func.func @transform_3(%arg0: i32) -> (i32, i32) {
    %c0_i32 = arith.constant 0 : i32
    %c0_i32_0 = arith.constant 0 : i32
    %c0_i32_1 = arith.constant 0 : i32
    return %c0_i32, %c0_i32_0 : i32, i32
  }
  func.func @transform_4(%arg0: i32) -> (i32, i32) {
    %c0_i32 = arith.constant 0 : i32
    %c0_i32_0 = arith.constant 0 : i32
    %c0_i32_1 = arith.constant 0 : i32
    return %c0_i32, %c0_i32_0 : i32, i32
  }
  func.func @transform_5(%arg0: i32) -> (i32, i32, i32) {
    %c0_i32 = arith.constant 0 : i32
    %c0_i32_0 = arith.constant 0 : i32
    %c0_i32_1 = arith.constant 0 : i32
    %c0_i32_2 = arith.constant 0 : i32
    return %c0_i32, %c0_i32_0, %c0_i32_1 : i32, i32, i32
  }
}

</mosaic_0001>

<bundles_post_ra>
// kernel: lstm_tagger_forward.1
= control target key start
LH: loop header
LB: loop body
LE: loop exit
PB: predicated region body
PF: predicated region fallthrough
CT: control target
= control target key end

     0   :  { %v2961_v2 = vmov 0   ;;  %v2962_v7 = vmov 0.0   ;;  %s3801_s0 = inlined_call_operand.vmem [shape: s32[16,1], index: 0, kind: input, shape index: {}]   ;;  %s3802_s1 = inlined_call_operand.vmem [shape: f32[16,512], index: 1, kind: input, shape index: {}]   ;;  %s3803_s2 = inlined_call_operand.vmem [shape: f32[128,512], index: 2, kind: input, shape index: {}]   ;;  %s3804_s3 = inlined_call_operand.vmem [shape: f32[128,128], index: 3, kind: input, shape index: {}]   ;;  %s3805_s4 = inlined_call_operand.vmem [shape: f32[1,128], index: 4, kind: input, shape index: {}]   ;;  %s3806_s5 = inlined_call_operand.hbm [shape: f32[2,8,128], index: 5, kind: output, shape index: {}]  }
   0x1   :  { %v21_v0 = vld [vmem:[%s3801_s0] sm:$0xff]  ;;  %v207_v1 = vld [vmem:[%s3803_s2 + $0x8] sm:$0xff]  ;;  %2800 = vset.pattern.permute.xlu0 %v2961_v2  ;;  %116 = vmatprep.mubr.f32.mxu1 %v2962_v7  ;;  %v40_v35 = vld [vmem:[%s3802_s1 + $0x18] sm:$0xff] }
   0x2   :  { %v22_v3 = vld [vmem:[%s3801_s0 + $0x8] sm:$0xff]  ;;  %v206_v5 = vld [vmem:[%s3803_s2] sm:$0xff]  ;;  %26 = vperm.xlu0 %2800, %v21_v0   ;;  %334 = vmatprep.mubr.f32.mxu0 %v2962_v7  ;;  %v44_v37 = vld [vmem:[%s3802_s1 + $0x38] sm:$0xff] }
   0x3   :  { %v211_v4 = vld [vmem:[%s3803_s2 + $0x28] sm:$0xff]  ;;  %v210_v6 = vld [vmem:[%s3803_s2 + $0x20] sm:$0xff]  ;;  %v2246_v41 = vpack.c.bf16 %v44_v37, %v40_v35 }
   0x4   :  { %v3016_v8 = vpack.c.bf16 %v211_v4, %v207_v1  ;;  %v3018_v9 = vpack.c.bf16 %v210_v6, %v206_v5  ;;  %v215_v10 = vld [vmem:[%s3803_s2 + $0x48] sm:$0xff]  ;;  %v214_v12 = vld [vmem:[%s3803_s2 + $0x40] sm:$0xff] }
   0x5   :  { %v219_v11 = vld [vmem:[%s3803_s2 + $0x68] sm:$0xff]  ;;  %v218_v14 = vld [vmem:[%s3803_s2 + $0x60] sm:$0xff] }
   0x6   :  { %v3030_v13 = vpack.c.bf16 %v219_v11, %v215_v10  ;;  %v223_v15 = vld [vmem:[%s3803_s2 + $0x88] sm:$0xff]  ;;  %2251 = vmatprep.subr.bf16.mxu0 %v3016_v8  ;;  %v3043_v17 = vpack.c.bf16 %v218_v14, %v214_v12  ;;  %29 = vperm.xlu0 %2800, %v22_v3   ;;  %v222_v19 = vld [vmem:[%s3803_s2 + $0x80] sm:$0xff] }
   0x7   :  { %v227_v16 = vld [vmem:[%s3803_s2 + $0xa8] sm:$0xff]  ;;  %2253 = vmatpush1.bf16.msra.mxu0 %v3018_v9  ;;  %v226_v20 = vld [vmem:[%s3803_s2 + $0xa0] sm:$0xff] }
   0x8   :  { %2255 = vmatprep.subr.bf16.mxu0 %v3030_v13  ;;  %v3046_v18 = vpack.c.bf16 %v227_v16, %v223_v15  ;;  %v231_v21 = vld [vmem:[%s3803_s2 + $0xc8] sm:$0xff]  ;;  %v3061_v23 = vpack.c.bf16 %v226_v20, %v222_v19  ;;  %v230_v24 = vld [vmem:[%s3803_s2 + $0xc0] sm:$0xff] }
   0x9   :  { %v235_v22 = vld [vmem:[%s3803_s2 + $0xe8] sm:$0xff]  ;;  %v234_v25 = vld [vmem:[%s3803_s2 + $0xe0] sm:$0xff] }
   0xa   :  { %v3070_v26 = vpack.c.bf16 %v235_v22, %v231_v21  ;;  %v38_v27 = vld [vmem:[%s3802_s1 + $0x8] sm:$0xff]  ;;  %v37_v29 = vld [vmem:[%s3802_s1] sm:$0xff]  ;;  %v3094_v36 = vpack.c.bf16 %v234_v25, %v230_v24 }
   0xb   :  { %2257 = vmatpush1.bf16.msra.mxu0 %v3043_v17  ;;  %v42_v28 = vld [vmem:[%s3802_s1 + $0x28] sm:$0xff]  ;;  %v41_v33 = vld [vmem:[%s3802_s1 + $0x20] sm:$0xff] }
   0xc   :  { %2259 = vmatprep.subr.bf16.mxu0 %v3046_v18  ;;  %v239_v30 = vld [vmem:[%s3803_s2 + $0x108] sm:$0xff]  ;;  %v2242_v32 = vpack.c.bf16 %v42_v28, %v38_v27  ;;  %v2244_v34 = vpack.c.bf16 %v41_v33, %v37_v29  ;;  %v238_v39 = vld [vmem:[%s3803_s2 + $0x100] sm:$0xff] }
   0xd   :  { %v243_v31 = vld [vmem:[%s3803_s2 + $0x128] sm:$0xff]  ;;  %v242_v40 = vld [vmem:[%s3803_s2 + $0x120] sm:$0xff] }
   0xe   :  { %2243 = vmatprep.subr.bf16.mxu1 %v2242_v32  ;;  %v3100_v38 = vpack.c.bf16 %v243_v31, %v239_v30  ;;  %v247_v42 = vld [vmem:[%s3803_s2 + $0x148] sm:$0xff] }
   0xf   :  { %2261 = vmatpush1.bf16.msra.mxu0 %v3061_v23  ;;  %2245 = vmatpush1.bf16.msra.mxu1 %v2244_v34  ;;  %v251_v43 = vld [vmem:[%s3803_s2 + $0x168] sm:$0xff] }
  0x10   :  { %2263 = vmatprep.subr.bf16.mxu0 %v3070_v26  ;;  %2247 = vmatprep.subr.bf16.mxu1 %v2246_v41 }
  0x11   :  { %10 = vsyncpa [#allocation3], 0  ;;  %v3115_v44 = vpack.c.bf16 %v242_v40, %v238_v39  ;;  %v3118_v45 = vpack.c.bf16 %v251_v43, %v247_v42  ;;  %v246_v46 = vld [vmem:[%s3803_s2 + $0x140] sm:$0xff]  ;;  %v255_v48 = vld [vmem:[%s3803_s2 + $0x188] sm:$0xff]  ;;  %v23_v61 = vlaneseq  ;;  %vm45_vm0 = vcmask 130048  }
  0x12   :  { %v250_v47 = vld [vmem:[%s3803_s2 + $0x160] sm:$0xff]  ;;  %v259_v49 = vld [vmem:[%s3803_s2 + $0x1a8] sm:$0xff]  ;;  %v39_v63 = vld [vmem:[%s3802_s1 + $0x10] sm:$0xff]  ;;  %vm2001_vm3 = vcmask 1040384   ;;  %vm2004_vm4 = vcmask 1041408   ;;  %vm2007_vm5 = vcmask 1042432  }
  0x13   :  { %2265 = vmatpush1.bf16.msra.mxu0 %v3094_v36  ;;  %v3133_v50 = vpack.c.bf16 %v250_v47, %v246_v46  ;;  %v3136_v51 = vpack.c.bf16 %v259_v49, %v255_v48  ;;  %v254_v52 = vld [vmem:[%s3803_s2 + $0x180] sm:$0xff]  ;;  %v263_v54 = vld [vmem:[%s3803_s2 + $0x1c8] sm:$0xff]  ;;  %v24_v62 = vand.u32 127, %v23_v61  ;;  %v43_v0 = vld [vmem:[%s3802_s1 + $0x30] sm:$0xff]  ;;  %vm2010_vm6 = vcmask 1043456  }
  0x14   :  { %2267 = vmatprep.subr.bf16.mxu0 %v3100_v38  ;;  %v258_v53 = vld [vmem:[%s3803_s2 + $0x1a0] sm:$0xff]  ;;  %v267_v55 = vld [vmem:[%s3803_s2 + $0x1e8] sm:$0xff]  ;;  %v209_v1 = vld [vmem:[%s3803_s2 + $0x18] sm:$0xff]  ;;  %v2248_v4 = vpack.c.bf16 %v43_v0, %v39_v63  ;;  %vm2013_vm7 = vcmask 1044480   ;;  %vm2016_vm8 = vcmask 1045504   ;;  %vm2019_vm9 = vcmask 1046528  }
  0x15   :  { %v3151_v56 = vpack.c.bf16 %v258_v53, %v254_v52  ;;  %v3154_v57 = vpack.c.bf16 %v267_v55, %v263_v54  ;;  %v262_v58 = vld [vmem:[%s3803_s2 + $0x1c0] sm:$0xff]  ;;  %v213_v2 = vld [vmem:[%s3803_s2 + $0x38] sm:$0xff]  ;;  %v208_v11 = vld [vmem:[%s3803_s2 + $0x10] sm:$0xff] }
  0x16   :  { %v266_v59 = vld [vmem:[%s3803_s2 + $0x1e0] sm:$0xff]  ;;  %v3199_v5 = vpack.c.bf16 %v213_v2, %v209_v1  ;;  %v212_v12 = vld [vmem:[%s3803_s2 + $0x30] sm:$0xff]  ;;  %v217_v15 = vld [vmem:[%s3803_s2 + $0x58] sm:$0xff] }
  0x17   :  { %2269 = vmatpush1.bf16.msra.mxu0 %v3115_v44  ;;  %v3163_v60 = vpack.c.bf16 %v266_v59, %v262_v58  ;;  %v221_v16 = vld [vmem:[%s3803_s2 + $0x78] sm:$0xff]  ;;  %v3220_v19 = vpack.c.bf16 %v212_v12, %v208_v11  ;;  %v216_v21 = vld [vmem:[%s3803_s2 + $0x50] sm:$0xff] }
  0x18   :  { %2271 = vmatprep.subr.bf16.mxu0 %v3118_v45  ;;  %v3222_v20 = vpack.c.bf16 %v221_v16, %v217_v15  ;;  %v220_v22 = vld [vmem:[%s3803_s2 + $0x70] sm:$0xff]  ;;  %v225_v24 = vld [vmem:[%s3803_s2 + $0x98] sm:$0xff] }
  0x19   :  { %v229_v25 = vld [vmem:[%s3803_s2 + $0xb8] sm:$0xff]  ;;  %v3239_v27 = vpack.c.bf16 %v220_v22, %v216_v21  ;;  %v224_v29 = vld [vmem:[%s3803_s2 + $0x90] sm:$0xff] }
  0x1a   :  { %v3242_v28 = vpack.c.bf16 %v229_v25, %v225_v24  ;;  %v228_v30 = vld [vmem:[%s3803_s2 + $0xb0] sm:$0xff]  ;;  %v233_v31 = vld [vmem:[%s3803_s2 + $0xd8] sm:$0xff] }
  0x1b   :  { %2273 = vmatpush1.bf16.msra.mxu0 %v3133_v50  ;;  %v237_v32 = vld [vmem:[%s3803_s2 + $0xf8] sm:$0xff]  ;;  %v3258_v33 = vpack.c.bf16 %v228_v30, %v224_v29  ;;  %v232_v35 = vld [vmem:[%s3803_s2 + $0xd0] sm:$0xff] }
  0x1c   :  { %2275 = vmatprep.subr.bf16.mxu0 %v3136_v51  ;;  %v3262_v34 = vpack.c.bf16 %v237_v32, %v233_v31  ;;  %v236_v37 = vld [vmem:[%s3803_s2 + $0xf0] sm:$0xff]  ;;  %v241_v39 = vld [vmem:[%s3803_s2 + $0x118] sm:$0xff] }
  0x1d   :  { %v245_v40 = vld [vmem:[%s3803_s2 + $0x138] sm:$0xff]  ;;  %v3277_v41 = vpack.c.bf16 %v236_v37, %v232_v35  ;;  %v240_v43 = vld [vmem:[%s3803_s2 + $0x110] sm:$0xff] }
  0x1e   :  { %v3280_v42 = vpack.c.bf16 %v245_v40, %v241_v39  ;;  %v244_v46 = vld [vmem:[%s3803_s2 + $0x130] sm:$0xff]  ;;  %v249_v47 = vld [vmem:[%s3803_s2 + $0x158] sm:$0xff] }
  0x1f   :  { %2277 = vmatpush1.bf16.msra.mxu0 %v3151_v56  ;;  %v253_v48 = vld [vmem:[%s3803_s2 + $0x178] sm:$0xff]  ;;  %v3295_v49 = vpack.c.bf16 %v244_v46, %v240_v43  ;;  %v248_v53 = vld [vmem:[%s3803_s2 + $0x150] sm:$0xff] }
  0x20   :  { %2279 = vmatprep.subr.bf16.mxu0 %v3154_v57  ;;  %v3298_v52 = vpack.c.bf16 %v253_v48, %v249_v47  ;;  %v252_v54 = vld [vmem:[%s3803_s2 + $0x170] sm:$0xff]  ;;  %v257_v55 = vld [vmem:[%s3803_s2 + $0x198] sm:$0xff] }
  0x21   :  { %v261_v58 = vld [vmem:[%s3803_s2 + $0x1b8] sm:$0xff]  ;;  %v3313_v59 = vpack.c.bf16 %v252_v54, %v248_v53  ;;  %v256_v63 = vld [vmem:[%s3803_s2 + $0x190] sm:$0xff] }
  0x22   :  { %v260_v0 = vld [vmem:[%s3803_s2 + $0x1b0] sm:$0xff]  ;;  %v265_v1 = vld [vmem:[%s3803_s2 + $0x1d8] sm:$0xff] }
  0x23   :  { %2281 = vmatpush1.bf16.msra.mxu0 %v3163_v60  ;;  %v269_v2 = vld [vmem:[%s3803_s2 + $0x1f8] sm:$0xff] }
  0x24   :  { %2315 = vmatprep.subr.bf16.mxu0 %v3016_v8 }
  0x26   :  { %335 = vmatmul.mubr.f32.vlgmr.msra.gmra.mrb[0].mxu0 %v2962_v7 }
  0x27   :  { %2317 = vmatpush1.bf16.msra.mxu0 %v3018_v9  ;;  %504 = vmatprep.mubr.f32.mxu0 %v2962_v7 }
  0x28   :  { %2319 = vmatprep.subr.bf16.mxu0 %v3030_v13 }
  0x2b   :  { %2321 = vmatpush1.bf16.msra.mxu0 %v3043_v17 }
  0x2c   :  { %2323 = vmatprep.subr.bf16.mxu0 %v3046_v18 }
  0x2f   :  { %2325 = vmatpush1.bf16.msra.mxu0 %v3061_v23 }
  0x30   :  { %2327 = vmatprep.subr.bf16.mxu0 %v3070_v26 }
  0x33   :  { %2329 = vmatpush1.bf16.msra.mxu0 %v3094_v36 }
  0x34   :  { %2331 = vmatprep.subr.bf16.mxu0 %v3100_v38 }
  0x37   :  { %2333 = vmatpush1.bf16.msra.mxu0 %v3115_v44 }
  0x38   :  { %2335 = vmatprep.subr.bf16.mxu0 %v3118_v45 }
  0x3b   :  { %2337 = vmatpush1.bf16.msra.mxu0 %v3133_v50 }
  0x3c   :  { %2339 = vmatprep.subr.bf16.mxu0 %v3136_v51 }
  0x3f   :  { %2341 = vmatpush1.bf16.msra.mxu0 %v3151_v56 }
  0x40   :  { %2343 = vmatprep.subr.bf16.mxu0 %v3154_v57 }
  0x43   :  { %2345 = vmatpush1.bf16.msra.mxu0 %v3163_v60 }
  0x44   :  { %2379 = vmatprep.subr.bf16.mxu0 %v3016_v8 }
  0x81   :  { %v27_v3 = vpop.permute.xlu0 %26 }
  0x82   :  { %vm31_vm1 = vcmp.eq.s32.totalorder %v24_v62, %v27_v3  ;;  %v3331_v3 = vpack.c.bf16 %v260_v0, %v256_v63 }
  0x83   :  { %v2158_v6 = vsel %vm31_vm1, 1.0, %v2962_v7 }
  0x84   :  { %2160 = vmatmul.mubr.msk.f32.vlgmr.msra.gmra.mrb[0].mxu1 %vm45_vm0, %v2158_v6 }
  0x85   :  { %2249 = vmatpush1.bf16.msra.mxu1 %v2248_v4  ;;  %v30_v10 = vpop.permute.xlu0 %29  ;;  %122 = vmatprep.mubr.f32.mxu1 %v2962_v7  ;;  %v3334_v4 = vpack.c.bf16 %v269_v2, %v265_v1 }
  0x86   :  { %vm32_vm2 = vcmp.eq.s32.totalorder %v24_v62, %v30_v10  ;;  %2283 = vmatprep.subr.bf16.mxu1 %v3199_v5  ;;  %v3316_v62 = vpack.c.bf16 %v261_v58, %v257_v55  ;;  %v268_v10 = vld [vmem:[%s3803_s2 + $0x1f0] sm:$0xff] }
  0x87   :  { %v2159_v14 = vsel %vm32_vm2, 1.0, %v2962_v7 }
  0x88   :  { %2161 = vmatmul.mubr.msk.f32.gmra.mrb[2].mxu1 %vm45_vm0, %v2159_v14 }
  0x89   :  { %193 = vmatprep.mubr.f32.mxu1 %v2962_v7 }
  0x8c   :  { %2162 = vmatmul.mubr.msk.f32.vlgmr.msra.gmra.mrb[4].mxu1 %vm45_vm0, %v2158_v6  ;;  %v264_v6 = vld [vmem:[%s3803_s2 + $0x1d0] sm:$0xff] }
  0x8d   :  { %2285 = vmatpush1.bf16.msra.mxu1 %v3220_v19  ;;  %199 = vmatprep.mubr.f32.mxu1 %v2962_v7  ;;  %v3343_v11 = vpack.c.bf16 %v268_v10, %v264_v6 }
  0x8e   :  { %2287 = vmatprep.subr.bf16.mxu1 %v3222_v20 }
  0x90   :  { %2163 = vmatmul.mubr.msk.f32.gmra.mrb[6].mxu1 %vm45_vm0, %v2159_v14 }
  0x91   :  { %2289 = vmatpush1.bf16.msra.mxu1 %v3239_v27  ;;  %405 = vmatprep.mubr.f32.mxu1 %v2962_v7 }
  0x92   :  { %2291 = vmatprep.subr.bf16.mxu1 %v3242_v28 }
  0x95   :  { %2293 = vmatpush1.bf16.msra.mxu1 %v3258_v33 }
  0x96   :  { %2295 = vmatprep.subr.bf16.mxu1 %v3262_v34 }
  0x99   :  { %2297 = vmatpush1.bf16.msra.mxu1 %v3277_v41 }
  0x9a   :  { %2299 = vmatprep.subr.bf16.mxu1 %v3280_v42 }
  0x9d   :  { %2301 = vmatpush1.bf16.msra.mxu1 %v3295_v49 }
  0x9e   :  { %2303 = vmatprep.subr.bf16.mxu1 %v3298_v52 }
  0xa1   :  { %2305 = vmatpush1.bf16.msra.mxu1 %v3313_v59 }
  0xa2   :  { %2307 = vmatprep.subr.bf16.mxu1 %v3316_v62 }
  0xa5   :  { %2309 = vmatpush1.bf16.msra.mxu1 %v3331_v3 }
  0xa6   :  { %2311 = vmatprep.subr.bf16.mxu1 %v3334_v4 }
  0xa9   :  { %2313 = vmatpush1.bf16.msra.mxu1 %v3343_v11 }
  0xaa   :  { %2347 = vmatprep.subr.bf16.mxu1 %v3199_v5 }
  0xac   :  { %406 = vmatmul.mubr.f32.vlgmr.msra.gmra.mrb[8].mxu1 %v2962_v7 }
  0xad   :  { %2349 = vmatpush1.bf16.msra.mxu1 %v3220_v19  ;;  %575 = vmatprep.mubr.f32.mxu1 %v2962_v7 }
  0xae   :  { %2351 = vmatprep.subr.bf16.mxu1 %v3222_v20 }
  0xb1   :  { %2353 = vmatpush1.bf16.msra.mxu1 %v3239_v27 }
  0xb2   :  { %2355 = vmatprep.subr.bf16.mxu1 %v3242_v28 }
  0xb5   :  { %2357 = vmatpush1.bf16.msra.mxu1 %v3258_v33 }
  0xb6   :  { %2359 = vmatprep.subr.bf16.mxu1 %v3262_v34 }
  0xb9   :  { %2361 = vmatpush1.bf16.msra.mxu1 %v3277_v41 }
  0xba   :  { %2363 = vmatprep.subr.bf16.mxu1 %v3280_v42 }
  0xbd   :  { %2365 = vmatpush1.bf16.msra.mxu1 %v3295_v49 }
  0xbe   :  { %2367 = vmatprep.subr.bf16.mxu1 %v3298_v52 }
  0xc1   :  { %2369 = vmatpush1.bf16.msra.mxu1 %v3313_v59 }
  0xc2   :  { %2371 = vmatprep.subr.bf16.mxu1 %v3316_v62 }
  0xc5   :  { %2373 = vmatpush1.bf16.msra.mxu1 %v3331_v3 }
  0xc6   :  { %2375 = vmatprep.subr.bf16.mxu1 %v3334_v4 }
  0xc9   :  { %2377 = vmatpush1.bf16.msra.mxu1 %v3343_v11 }
  0xca   :  { %2411 = vmatprep.subr.bf16.mxu1 %v3199_v5 }
  0xf9   :  { %v336_v12 = vpop.f32.mrb[0].mxu0 }
  0xfa   :  { %v338_v14 = vpop.f32.mrb[1].mxu0 }
 0x157   :  { %v3366_v15 = vpop.f32.mrb[0].mxu1 }
 0x158   :  { %v412_v16 = vadd.f32 %v336_v12, %v3366_v15  ;;  %v3369_v21 = vpop.f32.mrb[1].mxu1 }
 0x159   :  { %v413_v22 = vadd.f32 %v338_v14, %v3369_v21  ;;  %v2963_v14 = vmov 1966171168  }
 0x15a   :  { %v2164_v37 = vmul.f32 -1.442695, %v412_v16  ;;  %v1740_v16 = vunpack.c.l.s4 %v2963_v14 }
 0x15b   :  { %v3372_v24 = vpop.f32.mrb[2].mxu1  ;;  %v2165_v35 = vmul.f32 -1.442695, %v413_v22 }
 0x15c   :  { %v3374_v25 = vpop.f32.mrb[3].mxu1  ;;  %v1741_v22 = vunpack.c.0.s8 %v1740_v16 }
 0x15d   :  { %2801 = vpow2.f32 %v2165_v35  ;;  %v3390_v35 = vshrl.u32 %v23_v61, 7 }
 0x15e   :  { %2803 = vpow2.f32 %v2164_v37 }
 0x15f   :  { %v3376_v29 = vpop.f32.mrb[4].mxu1 }
 0x160   :  { %v3378_v30 = vpop.f32.mrb[5].mxu1 }
 0x163   :  { %v3380_v31 = vpop.f32.mrb[6].mxu1 }
 0x164   :  { %v3382_v32 = vpop.f32.mrb[7].mxu1 }
 0x167   :  { %v2802_v39 = vpop.eup %2801 }
 0x168   :  { %v2804_v40 = vpop.eup %2803  ;;  %v425_v43 = vadd.f32 1.0, %v2802_v39  ;;  %v3393_v39 = vsub.s32 %v1741_v22, %v3390_v35 }
 0x169   :  { %v419_v46 = vadd.f32 1.0, %v2804_v40 }
 0x16a   :  { %2805 = vrcp.f32 %v425_v43 }
 0x16b   :  { %2807 = vrcp.f32 %v419_v46 }
 0x174   :  { %v2806_v58 = vpop.eup %2805 }
 0x175   :  { %v2808_v63 = vpop.eup %2807  ;;  %v435_v1 = vmul.f32 0.0, %v2806_v58 }
 0x17f   :  { %v407_v47 = vpop.f32.mrb[8].mxu1 }
 0x180   :  { %v414_v48 = vadd.f32 %v407_v47, %v3376_v29  ;;  %v409_v53 = vpop.f32.mrb[9].mxu1 }
 0x181   :  { %v415_v54 = vadd.f32 %v409_v53, %v3378_v30 }
 0x182   :  { %2809 = vtanh.f32 %v414_v48 }
 0x183   :  { %v2166_v55 = vmul.f32 -1.442695, %v415_v54 }
 0x185   :  { %2811 = vpow2.f32 %v2166_v55 }
 0x18c   :  { %v2810_v0 = vpop.eup %2809 }
 0x18d   :  { %v436_v2 = vmul.f32 %v2810_v0, %v2808_v63 }
 0x18f   :  { %v2812_v6 = vpop.eup %2811  ;;  %v3386_v10 = vadd.f32 %v436_v2, %v435_v1 }
 0x190   :  { %v432_v12 = vadd.f32 1.0, %v2812_v6 }
 0x191   :  { %2813 = vtanh.f32 %v3386_v10 }
 0x192   :  { %2815 = vrcp.f32 %v432_v12 }
 0x19b   :  { %v2814_v37 = vpop.eup %2813 }
 0x19c   :  { %v2816_v40 = vpop.eup %2815 }
 0x19d   :  { %v439_v43 = vmul.f32 %v2816_v40, %v2814_v37 }
 0x19f   :  { %505 = vmatmul.mubr.f32.vlgmr.msra.gmra.mrb[2].mxu0 %v439_v43  ;;  %v3396_v46 = vrot.slane %v439_v43, %v3393_v39  ;;  %576 = vmatmul.mubr.f32.vlgmr.msra.gmra.mrb[10].mxu1 %v439_v43 }
 0x1a0   :  { %2381 = vmatpush1.bf16.msra.mxu0 %v3018_v9  ;;  %2413 = vmatpush1.bf16.msra.mxu1 %v3220_v19 }
 0x1a1   :  { %v1746_v47 = vcombine.high %v3396_v46, %v3396_v46  ;;  %v1753_v61 = vrot.slane %v3396_v46, %v3393_v39  ;;  %2383 = vmatprep.subr.bf16.mxu0 %v3030_v13  ;;  %2415 = vmatprep.subr.bf16.mxu1 %v3222_v20 }
 0x1a2   :  { %692 = vmatprep.mubr.f32.mxu0 %v2962_v7  ;;  %763 = vmatprep.mubr.f32.mxu1 %v2962_v7 }
 0x1a3   :  { %v3409_v48 = vrot.slane %v1746_v47, %v3393_v39 }
 0x1a4   :  { %2385 = vmatpush1.bf16.msra.mxu0 %v3043_v17  ;;  %2417 = vmatpush1.bf16.msra.mxu1 %v3239_v27 }
 0x1a5   :  { %2387 = vmatprep.subr.bf16.mxu0 %v3046_v18  ;;  %2419 = vmatprep.subr.bf16.mxu1 %v3242_v28 }
 0x1a8   :  { %2389 = vmatpush1.bf16.msra.mxu0 %v3061_v23  ;;  %2421 = vmatpush1.bf16.msra.mxu1 %v3258_v33 }
 0x1a9   :  { %2391 = vmatprep.subr.bf16.mxu0 %v3070_v26  ;;  %2423 = vmatprep.subr.bf16.mxu1 %v3262_v34 }
 0x1ac   :  { %2393 = vmatpush1.bf16.msra.mxu0 %v3094_v36  ;;  %2425 = vmatpush1.bf16.msra.mxu1 %v3277_v41 }
 0x1ad   :  { %2395 = vmatprep.subr.bf16.mxu0 %v3100_v38  ;;  %2427 = vmatprep.subr.bf16.mxu1 %v3280_v42 }
 0x1b0   :  { %2397 = vmatpush1.bf16.msra.mxu0 %v3115_v44  ;;  %2429 = vmatpush1.bf16.msra.mxu1 %v3295_v49 }
 0x1b1   :  { %2399 = vmatprep.subr.bf16.mxu0 %v3118_v45  ;;  %2431 = vmatprep.subr.bf16.mxu1 %v3298_v52 }
 0x1b4   :  { %2401 = vmatpush1.bf16.msra.mxu0 %v3133_v50  ;;  %2433 = vmatpush1.bf16.msra.mxu1 %v3313_v59 }
 0x1b5   :  { %2403 = vmatprep.subr.bf16.mxu0 %v3136_v51  ;;  %2435 = vmatprep.subr.bf16.mxu1 %v3316_v62 }
 0x1b8   :  { %2405 = vmatpush1.bf16.msra.mxu0 %v3151_v56  ;;  %2437 = vmatpush1.bf16.msra.mxu1 %v3331_v3 }
 0x1b9   :  { %2407 = vmatprep.subr.bf16.mxu0 %v3154_v57  ;;  %2439 = vmatprep.subr.bf16.mxu1 %v3334_v4 }
 0x1bc   :  { %2409 = vmatpush1.bf16.msra.mxu0 %v3163_v60  ;;  %2441 = vmatpush1.bf16.msra.mxu1 %v3343_v11 }
 0x1bd   :  { %2443 = vmatprep.subr.bf16.mxu0 %v3016_v8  ;;  %2475 = vmatprep.subr.bf16.mxu1 %v3199_v5 }
 0x272   :  { %v506_v53 = vpop.f32.mrb[2].mxu0  ;;  %v577_v54 = vpop.f32.mrb[10].mxu1 }
 0x273   :  { %v586_v55 = vrot.slane %v506_v53, 6  ;;  %v588_v58 = vrot.slane %v577_v54, 6  ;;  %v508_v63 = vpop.f32.mrb[3].mxu0  ;;  %v579_v0 = vpop.f32.mrb[11].mxu1 }
 0x274   :  { %v587_v1 = vrot.slane %v508_v63, 6  ;;  %v589_v2 = vrot.slane %v579_v0, 6  ;;  %v618_v0 = vrot.slane %v3386_v10, 6 }
 0x275   :  { %v594_v6 = vadd.f32 %v586_v55, %v3366_v15  ;;  %v596_v12 = vadd.f32 %v588_v58, %v3376_v29 }
 0x276   :  { %v595_v14 = vadd.f32 %v587_v1, %v3369_v21  ;;  %v597_v16 = vadd.f32 %v589_v2, %v3378_v30 }
 0x277   :  { %v2167_v22 = vmul.f32 -1.442695, %v594_v6 }
 0x278   :  { %v2168_v37 = vmul.f32 -1.442695, %v595_v14  ;;  %v2169_v40 = vmul.f32 -1.442695, %v597_v16 }
 0x279   :  { %2817 = vpow2.f32 %v2167_v22 }
 0x27a   :  { %2819 = vpow2.f32 %v2168_v37 }
 0x27b   :  { %2821 = vpow2.f32 %v2169_v40 }
 0x27c   :  { %2823 = vtanh.f32 %v596_v12 }
 0x283   :  { %v2818_v43 = vpop.eup %2817 }
 0x284   :  { %v2820_v47 = vpop.eup %2819  ;;  %v601_v53 = vadd.f32 1.0, %v2818_v43 }
 0x285   :  { %v607_v54 = vadd.f32 1.0, %v2820_v47  ;;  %v2822_v55 = vpop.eup %2821  ;;  %v3449_v47 = vsub.s32 0, %v3390_v35 }
 0x286   :  { %2825 = vrcp.f32 %v601_v53  ;;  %v2824_v63 = vpop.eup %2823  ;;  %v614_v6 = vadd.f32 1.0, %v2822_v55 }
 0x287   :  { %2827 = vrcp.f32 %v607_v54 }
 0x288   :  { %2829 = vrcp.f32 %v614_v6 }
 0x290   :  { %v2826_v58 = vpop.eup %2825 }
 0x291   :  { %v2828_v1 = vpop.eup %2827  ;;  %v621_v2 = vmul.f32 %v2826_v58, %v2824_v63 }
 0x292   :  { %v620_v14 = vmul.f32 %v2828_v1, %v618_v0  ;;  %v2830_v16 = vpop.eup %2829 }
 0x294   :  { %v3444_v22 = vadd.f32 %v621_v2, %v620_v14 }
 0x296   :  { %2831 = vtanh.f32 %v3444_v22 }
 0x2a0   :  { %v2832_v37 = vpop.eup %2831 }
 0x2a1   :  { %v624_v12 = vmul.f32 %v2832_v37, %v2830_v16 }
 0x2a3   :  { %v626_v40 = vrot.slane %v624_v12, 2  ;;  %v1769_v43 = vrot.slane %v624_v12, %v3393_v39 }
 0x2a5   :  { %693 = vmatmul.mubr.f32.vlgmr.msra.gmra.mrb[4].mxu0 %v626_v40  ;;  %v1770_v10 = vcombine.high %v1769_v43, %v1769_v43  ;;  %v1777_v53 = vrot.slane %v1769_v43, %v3393_v39  ;;  %764 = vmatmul.mubr.f32.vlgmr.msra.gmra.mrb[12].mxu1 %v626_v40 }
 0x2a6   :  { %2445 = vmatpush1.bf16.msra.mxu0 %v3018_v9  ;;  %2477 = vmatpush1.bf16.msra.mxu1 %v3220_v19 }
 0x2a7   :  { %v1784_v54 = vrot.slane %v1770_v10, %v3393_v39  ;;  %v1785_v55 = vcombine.high %v1777_v53, %v1777_v53  ;;  %2447 = vmatprep.subr.bf16.mxu0 %v3030_v13  ;;  %2479 = vmatprep.subr.bf16.mxu1 %v3222_v20 }
 0x2a8   :  { %880 = vmatprep.mubr.f32.mxu0 %v2962_v7  ;;  %951 = vmatprep.mubr.f32.mxu1 %v2962_v7 }
 0x2a9   :  { %v1786_v35 = vcombine.high %v1784_v54, %v1784_v54  ;;  %v1934_v63 = vrot.slane %v1785_v55, %v3449_v47 }
 0x2aa   :  { %2449 = vmatpush1.bf16.msra.mxu0 %v3043_v17  ;;  %2481 = vmatpush1.bf16.msra.mxu1 %v3239_v27 }
 0x2ab   :  { %v1938_v58 = vrot.slane %v1786_v35, %v3449_v47  ;;  %2451 = vmatprep.subr.bf16.mxu0 %v3046_v18  ;;  %2483 = vmatprep.subr.bf16.mxu1 %v3242_v28  ;;  %v3468_v0 = vsel %vm2001_vm3, %v1753_v61, %v1934_v63 }
 0x2ad   :  { %v3471_v1 = vsel %vm2001_vm3, %v3409_v48, %v1938_v58 }
 0x2ae   :  { %2453 = vmatpush1.bf16.msra.mxu0 %v3061_v23  ;;  %2485 = vmatpush1.bf16.msra.mxu1 %v3258_v33 }
 0x2af   :  { %2455 = vmatprep.subr.bf16.mxu0 %v3070_v26  ;;  %2487 = vmatprep.subr.bf16.mxu1 %v3262_v34 }
 0x2b2   :  { %2457 = vmatpush1.bf16.msra.mxu0 %v3094_v36  ;;  %2489 = vmatpush1.bf16.msra.mxu1 %v3277_v41 }
 0x2b3   :  { %2459 = vmatprep.subr.bf16.mxu0 %v3100_v38  ;;  %2491 = vmatprep.subr.bf16.mxu1 %v3280_v42 }
 0x2b6   :  { %2461 = vmatpush1.bf16.msra.mxu0 %v3115_v44  ;;  %2493 = vmatpush1.bf16.msra.mxu1 %v3295_v49 }
 0x2b7   :  { %2463 = vmatprep.subr.bf16.mxu0 %v3118_v45  ;;  %2495 = vmatprep.subr.bf16.mxu1 %v3298_v52 }
 0x2ba   :  { %2465 = vmatpush1.bf16.msra.mxu0 %v3133_v50  ;;  %2497 = vmatpush1.bf16.msra.mxu1 %v3313_v59 }
 0x2bb   :  { %2467 = vmatprep.subr.bf16.mxu0 %v3136_v51  ;;  %2499 = vmatprep.subr.bf16.mxu1 %v3316_v62 }
 0x2be   :  { %2469 = vmatpush1.bf16.msra.mxu0 %v3151_v56  ;;  %2501 = vmatpush1.bf16.msra.mxu1 %v3331_v3 }
 0x2bf   :  { %2471 = vmatprep.subr.bf16.mxu0 %v3154_v57  ;;  %2503 = vmatprep.subr.bf16.mxu1 %v3334_v4 }
 0x2c2   :  { %2473 = vmatpush1.bf16.msra.mxu0 %v3163_v60  ;;  %2505 = vmatpush1.bf16.msra.mxu1 %v3343_v11 }
 0x2c3   :  { %2507 = vmatprep.subr.bf16.mxu0 %v3016_v8  ;;  %2539 = vmatprep.subr.bf16.mxu1 %v3199_v5 }
 0x378   :  { %v694_v46 = vpop.f32.mrb[4].mxu0  ;;  %v765_v61 = vpop.f32.mrb[12].mxu1 }
 0x379   :  { %v774_v48 = vrot.slane %v694_v46, 4  ;;  %v776_v2 = vrot.slane %v765_v61, 4  ;;  %v696_v6 = vpop.f32.mrb[5].mxu0  ;;  %v767_v14 = vpop.f32.mrb[13].mxu1 }
 0x37a   :  { %v775_v16 = vrot.slane %v696_v6, 4  ;;  %v777_v37 = vrot.slane %v767_v14, 4  ;;  %v806_v6 = vrot.slane %v3444_v22, 6 }
 0x37b   :  { %v782_v12 = vadd.f32 %v774_v48, %v3366_v15  ;;  %v784_v40 = vadd.f32 %v776_v2, %v3376_v29 }
 0x37c   :  { %v783_v43 = vadd.f32 %v775_v16, %v3369_v21  ;;  %v785_v10 = vadd.f32 %v777_v37, %v3378_v30 }
 0x37d   :  { %v2170_v53 = vmul.f32 -1.442695, %v782_v12 }
 0x37e   :  { %v2171_v54 = vmul.f32 -1.442695, %v783_v43  ;;  %v2172_v55 = vmul.f32 -1.442695, %v785_v10 }
 0x37f   :  { %2833 = vpow2.f32 %v2170_v53 }
 0x380   :  { %2835 = vpow2.f32 %v2171_v54 }
 0x381   :  { %2837 = vpow2.f32 %v2172_v55 }
 0x382   :  { %2839 = vtanh.f32 %v784_v40 }
 0x389   :  { %v2834_v35 = vpop.eup %2833 }
 0x38a   :  { %v2836_v63 = vpop.eup %2835  ;;  %v789_v58 = vadd.f32 1.0, %v2834_v35 }
 0x38b   :  { %v795_v46 = vadd.f32 1.0, %v2836_v63  ;;  %v2838_v61 = vpop.eup %2837 }
 0x38c   :  { %2841 = vrcp.f32 %v789_v58  ;;  %v2840_v48 = vpop.eup %2839  ;;  %v802_v37 = vadd.f32 1.0, %v2838_v61 }
 0x38d   :  { %2843 = vrcp.f32 %v795_v46 }
 0x38e   :  { %2845 = vrcp.f32 %v802_v37 }
 0x396   :  { %v2842_v2 = vpop.eup %2841 }
 0x397   :  { %v2844_v14 = vpop.eup %2843  ;;  %v809_v16 = vmul.f32 %v2842_v2, %v2840_v48 }
 0x398   :  { %v808_v12 = vmul.f32 %v2844_v14, %v806_v6  ;;  %v2846_v10 = vpop.eup %2845 }
 0x39a   :  { %v3502_v43 = vadd.f32 %v809_v16, %v808_v12 }
 0x39c   :  { %2847 = vtanh.f32 %v3502_v43 }
 0x3a6   :  { %v2848_v53 = vpop.eup %2847 }
 0x3a7   :  { %v812_v40 = vmul.f32 %v2848_v53, %v2846_v10 }
 0x3a9   :  { %v814_v54 = vrot.slane %v812_v40, 4  ;;  %v1787_v55 = vcombine.high %v812_v40, %v812_v40 }
 0x3ab   :  { %881 = vmatmul.mubr.f32.vlgmr.msra.gmra.mrb[6].mxu0 %v814_v54  ;;  %v1794_v35 = vrot.slane %v1787_v55, %v3393_v39  ;;  %952 = vmatmul.mubr.f32.vlgmr.msra.gmra.mrb[14].mxu1 %v814_v54 }
 0x3ac   :  { %2509 = vmatpush1.bf16.msra.mxu0 %v3018_v9  ;;  %2541 = vmatpush1.bf16.msra.mxu1 %v3220_v19 }
 0x3ad   :  { %v1795_v22 = vcombine.high %v1794_v35, %v1794_v35  ;;  %v1802_v63 = vrot.slane %v1794_v35, %v3393_v39  ;;  %2511 = vmatprep.subr.bf16.mxu0 %v3030_v13  ;;  %2543 = vmatprep.subr.bf16.mxu1 %v3222_v20 }
 0x3ae   :  { %1068 = vmatprep.mubr.f32.mxu0 %v2962_v7  ;;  %1139 = vmatprep.mubr.f32.mxu1 %v2962_v7 }
 0x3af   :  { %v1809_v58 = vrot.slane %v1795_v22, %v3393_v39  ;;  %v1944_v46 = vrot.slane %v1802_v63, %v3449_v47 }
 0x3b0   :  { %2513 = vmatpush1.bf16.msra.mxu0 %v3043_v17  ;;  %2545 = vmatpush1.bf16.msra.mxu1 %v3239_v27 }
 0x3b1   :  { %2515 = vmatprep.subr.bf16.mxu0 %v3046_v18  ;;  %2547 = vmatprep.subr.bf16.mxu1 %v3242_v28  ;;  %v3520_v61 = vsel %vm2004_vm4, %v3468_v0, %v1944_v46  ;;  %v1948_v48 = vrot.slane %v1809_v58, %v3449_v47 }
 0x3b3   :  { %v3524_v2 = vsel %vm2004_vm4, %v3471_v1, %v1948_v48 }
 0x3b4   :  { %2517 = vmatpush1.bf16.msra.mxu0 %v3061_v23  ;;  %2549 = vmatpush1.bf16.msra.mxu1 %v3258_v33 }
 0x3b5   :  { %2519 = vmatprep.subr.bf16.mxu0 %v3070_v26  ;;  %2551 = vmatprep.subr.bf16.mxu1 %v3262_v34 }
 0x3b8   :  { %2521 = vmatpush1.bf16.msra.mxu0 %v3094_v36  ;;  %2553 = vmatpush1.bf16.msra.mxu1 %v3277_v41 }
 0x3b9   :  { %2523 = vmatprep.subr.bf16.mxu0 %v3100_v38  ;;  %2555 = vmatprep.subr.bf16.mxu1 %v3280_v42 }
 0x3bc   :  { %2525 = vmatpush1.bf16.msra.mxu0 %v3115_v44  ;;  %2557 = vmatpush1.bf16.msra.mxu1 %v3295_v49 }
 0x3bd   :  { %2527 = vmatprep.subr.bf16.mxu0 %v3118_v45  ;;  %2559 = vmatprep.subr.bf16.mxu1 %v3298_v52 }
 0x3c0   :  { %2529 = vmatpush1.bf16.msra.mxu0 %v3133_v50  ;;  %2561 = vmatpush1.bf16.msra.mxu1 %v3313_v59 }
 0x3c1   :  { %2531 = vmatprep.subr.bf16.mxu0 %v3136_v51  ;;  %2563 = vmatprep.subr.bf16.mxu1 %v3316_v62 }
 0x3c4   :  { %2533 = vmatpush1.bf16.msra.mxu0 %v3151_v56  ;;  %2565 = vmatpush1.bf16.msra.mxu1 %v3331_v3 }
 0x3c5   :  { %2535 = vmatprep.subr.bf16.mxu0 %v3154_v57  ;;  %2567 = vmatprep.subr.bf16.mxu1 %v3334_v4 }
 0x3c8   :  { %2537 = vmatpush1.bf16.msra.mxu0 %v3163_v60  ;;  %2569 = vmatpush1.bf16.msra.mxu1 %v3343_v11 }
 0x3c9   :  { %2571 = vmatprep.subr.bf16.mxu0 %v3016_v8  ;;  %2603 = vmatprep.subr.bf16.mxu1 %v3199_v5 }
 0x47e   :  { %v882_v0 = vpop.f32.mrb[6].mxu0  ;;  %v953_v1 = vpop.f32.mrb[14].mxu1 }
 0x47f   :  { %v962_v6 = vrot.slane %v882_v0, 2  ;;  %v964_v14 = vrot.slane %v953_v1, 2  ;;  %v884_v16 = vpop.f32.mrb[7].mxu0  ;;  %v955_v37 = vpop.f32.mrb[15].mxu1 }
 0x480   :  { %v963_v12 = vrot.slane %v884_v16, 2  ;;  %v965_v10 = vrot.slane %v955_v37, 2 }
 0x481   :  { %v970_v53 = vadd.f32 %v962_v6, %v3366_v15  ;;  %v972_v40 = vadd.f32 %v964_v14, %v3376_v29 }
 0x482   :  { %v971_v54 = vadd.f32 %v963_v12, %v3369_v21  ;;  %v973_v55 = vadd.f32 %v965_v10, %v3378_v30  ;;  %v994_v21 = vrot.slane %v3502_v43, 6 }
 0x483   :  { %v2173_v35 = vmul.f32 -1.442695, %v970_v53 }
 0x484   :  { %v2174_v22 = vmul.f32 -1.442695, %v971_v54  ;;  %v2175_v63 = vmul.f32 -1.442695, %v973_v55 }
 0x485   :  { %2849 = vpow2.f32 %v2173_v35 }
 0x486   :  { %2851 = vpow2.f32 %v2174_v22 }
 0x487   :  { %2853 = vpow2.f32 %v2175_v63 }
 0x488   :  { %2855 = vtanh.f32 %v972_v40 }
 0x48f   :  { %v2850_v58 = vpop.eup %2849 }
 0x490   :  { %v2852_v46 = vpop.eup %2851  ;;  %v977_v48 = vadd.f32 1.0, %v2850_v58 }
 0x491   :  { %v983_v0 = vadd.f32 1.0, %v2852_v46  ;;  %v2854_v15 = vpop.eup %2853 }
 0x492   :  { %2857 = vrcp.f32 %v977_v48  ;;  %v2856_v1 = vpop.eup %2855  ;;  %v990_v14 = vadd.f32 1.0, %v2854_v15 }
 0x493   :  { %2859 = vrcp.f32 %v983_v0 }
 0x494   :  { %2861 = vrcp.f32 %v990_v14 }
 0x49c   :  { %v2858_v29 = vpop.eup %2857 }
 0x49d   :  { %v2860_v6 = vpop.eup %2859  ;;  %v997_v30 = vmul.f32 %v2858_v29, %v2856_v1 }
 0x49e   :  { %v996_v16 = vmul.f32 %v2860_v6, %v994_v21  ;;  %v2862_v12 = vpop.eup %2861 }
 0x4a0   :  { %v3555_v37 = vadd.f32 %v997_v30, %v996_v16 }
 0x4a2   :  { %2863 = vtanh.f32 %v3555_v37 }
 0x4ac   :  { %v2864_v10 = vpop.eup %2863 }
 0x4ad   :  { %v1000_v53 = vmul.f32 %v2864_v10, %v2862_v12 }
 0x4af   :  { %v1002_v40 = vrot.slane %v1000_v53, 6  ;;  %v1810_v54 = vcombine.high %v1000_v53, %v1000_v53 }
 0x4b1   :  { %1069 = vmatmul.mubr.f32.vlgmr.msra.gmra.mrb[8].mxu0 %v1002_v40  ;;  %v1817_v55 = vrot.slane %v1810_v54, %v3393_v39  ;;  %1140 = vmatmul.mubr.f32.vlgmr.msra.gmra.mrb[16].mxu1 %v1002_v40 }
 0x4b2   :  { %2573 = vmatpush1.bf16.msra.mxu0 %v3018_v9  ;;  %2605 = vmatpush1.bf16.msra.mxu1 %v3220_v19 }
 0x4b3   :  { %v1818_v43 = vcombine.high %v1817_v55, %v1817_v55  ;;  %v1825_v35 = vrot.slane %v1817_v55, %v3393_v39  ;;  %2575 = vmatprep.subr.bf16.mxu0 %v3030_v13  ;;  %2607 = vmatprep.subr.bf16.mxu1 %v3222_v20 }
 0x4b4   :  { %1241 = vmatprep.mubr.f32.mxu0 %v2962_v7  ;;  %1312 = vmatprep.mubr.f32.mxu1 %v2962_v7 }
 0x4b5   :  { %v1832_v22 = vrot.slane %v1818_v43, %v3393_v39  ;;  %v1833_v63 = vcombine.high %v1825_v35, %v1825_v35 }
 0x4b6   :  { %2577 = vmatpush1.bf16.msra.mxu0 %v3043_v17  ;;  %2609 = vmatpush1.bf16.msra.mxu1 %v3239_v27 }
 0x4b7   :  { %v1834_v58 = vcombine.high %v1832_v22, %v1832_v22  ;;  %2579 = vmatprep.subr.bf16.mxu0 %v3046_v18  ;;  %2611 = vmatprep.subr.bf16.mxu1 %v3242_v28  ;;  %v1954_v46 = vrot.slane %v1833_v63, %v3449_v47  ;;  %v1170_v63 = vrot.slane %v3555_v37, 6 }
 0x4b9   :  { %v3573_v48 = vsel %vm2007_vm5, %v3520_v61, %v1954_v46  ;;  %v1958_v0 = vrot.slane %v1834_v58, %v3449_v47 }
 0x4ba   :  { %2581 = vmatpush1.bf16.msra.mxu0 %v3061_v23  ;;  %2613 = vmatpush1.bf16.msra.mxu1 %v3258_v33 }
 0x4bb   :  { %2583 = vmatprep.subr.bf16.mxu0 %v3070_v26  ;;  %2615 = vmatprep.subr.bf16.mxu1 %v3262_v34  ;;  %v3581_v15 = vsel %vm2007_vm5, %v3524_v2, %v1958_v0 }
 0x4be   :  { %2585 = vmatpush1.bf16.msra.mxu0 %v3094_v36  ;;  %2617 = vmatpush1.bf16.msra.mxu1 %v3277_v41 }
 0x4bf   :  { %2587 = vmatprep.subr.bf16.mxu0 %v3100_v38  ;;  %2619 = vmatprep.subr.bf16.mxu1 %v3280_v42 }
 0x4c2   :  { %2589 = vmatpush1.bf16.msra.mxu0 %v3115_v44  ;;  %2621 = vmatpush1.bf16.msra.mxu1 %v3295_v49 }
 0x4c3   :  { %2591 = vmatprep.subr.bf16.mxu0 %v3118_v45  ;;  %2623 = vmatprep.subr.bf16.mxu1 %v3298_v52 }
 0x4c6   :  { %2593 = vmatpush1.bf16.msra.mxu0 %v3133_v50  ;;  %2625 = vmatpush1.bf16.msra.mxu1 %v3313_v59 }
 0x4c7   :  { %2595 = vmatprep.subr.bf16.mxu0 %v3136_v51  ;;  %2627 = vmatprep.subr.bf16.mxu1 %v3316_v62 }
 0x4ca   :  { %2597 = vmatpush1.bf16.msra.mxu0 %v3151_v56  ;;  %2629 = vmatpush1.bf16.msra.mxu1 %v3331_v3 }
 0x4cb   :  { %2599 = vmatprep.subr.bf16.mxu0 %v3154_v57  ;;  %2631 = vmatprep.subr.bf16.mxu1 %v3334_v4 }
 0x4ce   :  { %2601 = vmatpush1.bf16.msra.mxu0 %v3163_v60  ;;  %2633 = vmatpush1.bf16.msra.mxu1 %v3343_v11 }
 0x4cf   :  { %2635 = vmatprep.subr.bf16.mxu0 %v3016_v8  ;;  %2667 = vmatprep.subr.bf16.mxu1 %v3199_v5 }
 0x584   :  { %v1070_v61 = vpop.f32.mrb[8].mxu0  ;;  %v1141_v2 = vpop.f32.mrb[16].mxu1 }
 0x585   :  { %v1146_v1 = vadd.f32 %v1070_v61, %v3372_v24  ;;  %v1148_v29 = vadd.f32 %v1141_v2, %v3380_v31  ;;  %v1072_v21 = vpop.f32.mrb[9].mxu0  ;;  %v1143_v6 = vpop.f32.mrb[17].mxu1 }
 0x586   :  { %v1147_v30 = vadd.f32 %v1072_v21, %v3374_v25  ;;  %v1149_v14 = vadd.f32 %v1143_v6, %v3382_v32 }
 0x587   :  { %v2176_v16 = vmul.f32 -1.442695, %v1146_v1 }
 0x588   :  { %v2177_v12 = vmul.f32 -1.442695, %v1147_v30  ;;  %v2178_v10 = vmul.f32 -1.442695, %v1149_v14 }
 0x589   :  { %2865 = vpow2.f32 %v2176_v16 }
 0x58a   :  { %2867 = vpow2.f32 %v2177_v12 }
 0x58b   :  { %2869 = vpow2.f32 %v2178_v10 }
 0x58c   :  { %2871 = vtanh.f32 %v1148_v29 }
 0x593   :  { %v2866_v53 = vpop.eup %2865 }
 0x594   :  { %v2868_v40 = vpop.eup %2867  ;;  %v1153_v54 = vadd.f32 1.0, %v2866_v53 }
 0x595   :  { %v1159_v55 = vadd.f32 1.0, %v2868_v40  ;;  %v2870_v43 = vpop.eup %2869 }
 0x596   :  { %2873 = vrcp.f32 %v1153_v54  ;;  %v2872_v35 = vpop.eup %2871  ;;  %v1166_v0 = vadd.f32 1.0, %v2870_v43 }
 0x597   :  { %2875 = vrcp.f32 %v1159_v55 }
 0x598   :  { %2877 = vrcp.f32 %v1166_v0 }
 0x5a0   :  { %v2874_v22 = vpop.eup %2873 }
 0x5a1   :  { %v2876_v58 = vpop.eup %2875  ;;  %v1173_v46 = vmul.f32 %v2874_v22, %v2872_v35 }
 0x5a2   :  { %v1172_v61 = vmul.f32 %v2876_v58, %v1170_v63  ;;  %v2878_v1 = vpop.eup %2877 }
 0x5a4   :  { %v3608_v2 = vadd.f32 %v1173_v46, %v1172_v61 }
 0x5a6   :  { %2879 = vtanh.f32 %v3608_v2 }
 0x5b0   :  { %v2880_v21 = vpop.eup %2879 }
 0x5b1   :  { %v1176_v29 = vmul.f32 %v2880_v21, %v2878_v1 }
 0x5b3   :  { %1242 = vmatmul.mubr.f32.vlgmr.msra.gmra.mrb[10].mxu0 %v1176_v29  ;;  %v1842_v6 = vrot.slane %v1176_v29, %v3393_v39  ;;  %1313 = vmatmul.mubr.f32.vlgmr.msra.gmra.mrb[18].mxu1 %v1176_v29 }
 0x5b4   :  { %2637 = vmatpush1.bf16.msra.mxu0 %v3018_v9  ;;  %2669 = vmatpush1.bf16.msra.mxu1 %v3220_v19 }
 0x5b5   :  { %v1843_v37 = vcombine.high %v1842_v6, %v1842_v6  ;;  %v1850_v30 = vrot.slane %v1842_v6, %v3393_v39  ;;  %2639 = vmatprep.subr.bf16.mxu0 %v3030_v13  ;;  %2671 = vmatprep.subr.bf16.mxu1 %v3222_v20 }
 0x5b6   :  { %1429 = vmatprep.mubr.f32.mxu0 %v2962_v7  ;;  %1500 = vmatprep.mubr.f32.mxu1 %v2962_v7 }
 0x5b7   :  { %v1857_v14 = vrot.slane %v1843_v37, %v3393_v39  ;;  %v1964_v16 = vrot.slane %v1850_v30, %v3449_v47 }
 0x5b8   :  { %2641 = vmatpush1.bf16.msra.mxu0 %v3043_v17  ;;  %2673 = vmatpush1.bf16.msra.mxu1 %v3239_v27 }
 0x5b9   :  { %2643 = vmatprep.subr.bf16.mxu0 %v3046_v18  ;;  %2675 = vmatprep.subr.bf16.mxu1 %v3242_v28  ;;  %v3626_v12 = vsel %vm2010_vm6, %v3573_v48, %v1964_v16  ;;  %v1968_v10 = vrot.slane %v1857_v14, %v3449_v47  ;;  %v1355_v16 = vrot.slane %v3608_v2, 6 }
 0x5bb   :  { %v3630_v53 = vsel %vm2010_vm6, %v3581_v15, %v1968_v10 }
 0x5bc   :  { %2645 = vmatpush1.bf16.msra.mxu0 %v3061_v23  ;;  %2677 = vmatpush1.bf16.msra.mxu1 %v3258_v33 }
 0x5bd   :  { %2647 = vmatprep.subr.bf16.mxu0 %v3070_v26  ;;  %2679 = vmatprep.subr.bf16.mxu1 %v3262_v34 }
 0x5c0   :  { %2649 = vmatpush1.bf16.msra.mxu0 %v3094_v36  ;;  %2681 = vmatpush1.bf16.msra.mxu1 %v3277_v41 }
 0x5c1   :  { %2651 = vmatprep.subr.bf16.mxu0 %v3100_v38  ;;  %2683 = vmatprep.subr.bf16.mxu1 %v3280_v42 }
 0x5c4   :  { %2653 = vmatpush1.bf16.msra.mxu0 %v3115_v44  ;;  %2685 = vmatpush1.bf16.msra.mxu1 %v3295_v49 }
 0x5c5   :  { %2655 = vmatprep.subr.bf16.mxu0 %v3118_v45  ;;  %2687 = vmatprep.subr.bf16.mxu1 %v3298_v52 }
 0x5c8   :  { %2657 = vmatpush1.bf16.msra.mxu0 %v3133_v50  ;;  %2689 = vmatpush1.bf16.msra.mxu1 %v3313_v59 }
 0x5c9   :  { %2659 = vmatprep.subr.bf16.mxu0 %v3136_v51  ;;  %2691 = vmatprep.subr.bf16.mxu1 %v3316_v62 }
 0x5cc   :  { %2661 = vmatpush1.bf16.msra.mxu0 %v3151_v56  ;;  %2693 = vmatpush1.bf16.msra.mxu1 %v3331_v3 }
 0x5cd   :  { %2663 = vmatprep.subr.bf16.mxu0 %v3154_v57  ;;  %2695 = vmatprep.subr.bf16.mxu1 %v3334_v4 }
 0x5d0   :  { %2665 = vmatpush1.bf16.msra.mxu0 %v3163_v60  ;;  %2697 = vmatpush1.bf16.msra.mxu1 %v3343_v11 }
 0x5d1   :  { %2699 = vmatprep.subr.bf16.mxu0 %v3016_v8  ;;  %2731 = vmatprep.subr.bf16.mxu1 %v3199_v5 }
 0x686   :  { %v1243_v48 = vpop.f32.mrb[10].mxu0  ;;  %v1314_v15 = vpop.f32.mrb[18].mxu1 }
 0x687   :  { %v1323_v40 = vrot.slane %v1243_v48, 6  ;;  %v1325_v54 = vrot.slane %v1314_v15, 6  ;;  %v1245_v55 = vpop.f32.mrb[11].mxu0  ;;  %v1316_v43 = vpop.f32.mrb[19].mxu1 }
 0x688   :  { %v1324_v35 = vrot.slane %v1245_v55, 6  ;;  %v1326_v22 = vrot.slane %v1316_v43, 6 }
 0x689   :  { %v1331_v63 = vadd.f32 %v1323_v40, %v3372_v24  ;;  %v1333_v58 = vadd.f32 %v1325_v54, %v3380_v31 }
 0x68a   :  { %v1332_v46 = vadd.f32 %v1324_v35, %v3374_v25  ;;  %v1334_v0 = vadd.f32 %v1326_v22, %v3382_v32 }
 0x68b   :  { %v2179_v61 = vmul.f32 -1.442695, %v1331_v63 }
 0x68c   :  { %v2180_v8 = vmul.f32 -1.442695, %v1332_v46  ;;  %v2181_v5 = vmul.f32 -1.442695, %v1334_v0 }
 0x68d   :  { %2881 = vpow2.f32 %v2179_v61 }
 0x68e   :  { %2883 = vpow2.f32 %v2180_v8 }
 0x68f   :  { %2885 = vpow2.f32 %v2181_v5 }
 0x690   :  { %2887 = vtanh.f32 %v1333_v58 }
 0x697   :  { %v2882_v1 = vpop.eup %2881 }
 0x698   :  { %v2884_v21 = vpop.eup %2883  ;;  %v1338_v29 = vadd.f32 1.0, %v2882_v1 }
 0x699   :  { %v1344_v6 = vadd.f32 1.0, %v2884_v21  ;;  %v2886_v37 = vpop.eup %2885 }
 0x69a   :  { %2889 = vrcp.f32 %v1338_v29  ;;  %v2888_v30 = vpop.eup %2887  ;;  %v1351_v15 = vadd.f32 1.0, %v2886_v37 }
 0x69b   :  { %2891 = vrcp.f32 %v1344_v6 }
 0x69c   :  { %2893 = vrcp.f32 %v1351_v15  ;;  %v2022_v15 = vld [vmem:[%s3804_s3] sm:$0xff] }
 0x6a4   :  { %v2890_v14 = vpop.eup %2889 }
 0x6a5   :  { %v2892_v10 = vpop.eup %2891  ;;  %v1358_v48 = vmul.f32 %v2890_v14, %v2888_v30 }
 0x6a6   :  { %v1357_v40 = vmul.f32 %v2892_v10, %v1355_v16  ;;  %v2894_v55 = vpop.eup %2893 }
 0x6a8   :  { %v3661_v54 = vadd.f32 %v1358_v48, %v1357_v40  ;;  %v2023_v40 = vld [vmem:[%s3804_s3 + $0x8] sm:$0xff] }
 0x6aa   :  { %2895 = vtanh.f32 %v3661_v54 }
 0x6b4   :  { %v2896_v43 = vpop.eup %2895 }
 0x6b5   :  { %v1361_v35 = vmul.f32 %v2896_v43, %v2894_v55  ;;  %v2024_v55 = vld [vmem:[%s3804_s3 + $0x10] sm:$0xff]  ;;  %v2025_v43 = vld [vmem:[%s3804_s3 + $0x18] sm:$0xff] }
 0x6b7   :  { %v1363_v22 = vrot.slane %v1361_v35, 2  ;;  %v1864_v63 = vrot.slane %v1361_v35, %v3393_v39  ;;  %v2766_v35 = vpack.c.bf16 %v2025_v43, %v2024_v55 }
 0x6b9   :  { %1430 = vmatmul.mubr.f32.vlgmr.msra.gmra.mrb[12].mxu0 %v1363_v22  ;;  %v1865_v58 = vcombine.high %v1864_v63, %v1864_v63  ;;  %1501 = vmatmul.mubr.f32.vlgmr.msra.gmra.mrb[20].mxu1 %v1363_v22  ;;  %v1872_v2 = vrot.slane %v1864_v63, %v3393_v39  ;;  %v2026_v22 = vld [vmem:[%s3804_s3 + $0x20] sm:$0xff]  ;;  %v2027_v63 = vld [vmem:[%s3804_s3 + $0x28] sm:$0xff] }
 0x6ba   :  { %2701 = vmatpush1.bf16.msra.mxu0 %v3018_v9  ;;  %2733 = vmatpush1.bf16.msra.mxu1 %v3220_v19 }
 0x6bb   :  { %2703 = vmatprep.subr.bf16.mxu0 %v3030_v13  ;;  %2735 = vmatprep.subr.bf16.mxu1 %v3222_v20  ;;  %v1880_v46 = vcombine.high %v1872_v2, %v1872_v2  ;;  %v1879_v0 = vrot.slane %v1865_v58, %v3393_v39  ;;  %v2028_v58 = vld [vmem:[%s3804_s3 + $0x30] sm:$0xff]  ;;  %v2770_v2 = vpack.c.bf16 %v2027_v63, %v2026_v22  ;;  %v2188_v22 = vld [vmem:[%s3805_s4] ss:$0 sm:$0xff]  ;;  %s2964_s4 = smov [#allocation2]  }
 0x6bc   :  { %1617 = vmatprep.mubr.f32.mxu0 %v2962_v7  ;;  %1688 = vmatprep.mubr.f32.mxu1 %v2962_v7  ;;  %s2147_s11 = sshll.u32 %s2964_s4, 4  ;;  %s2148_s11 = int_to_ptr.vmem [resolvable:$true] %s2147_s11 }
 0x6bd   :  { %v1974_v61 = vrot.slane %v1880_v46, %v3449_v47  ;;  %v1881_v8 = vcombine.high %v1879_v0, %v1879_v0  ;;  %v2029_v46 = vld [vmem:[%s3804_s3 + $0x38] sm:$0xff]  ;;  %s2937_s12 = scalar_lea.vmem %s2148_s11, 256  ;;  %p2942_p1 = scmp.lt.s32.totalorder %s2148_s11, %s2148_s11 }
 0x6be   :  { %2705 = vmatpush1.bf16.msra.mxu0 %v3043_v17  ;;  %2737 = vmatpush1.bf16.msra.mxu1 %v3239_v27  ;;  %v2774_v0 = vpack.c.bf16 %v2029_v46, %v2028_v58  ;;  %p2938_p0 = scmp.ne.s32.totalorder %s2148_s11, %s2937_s12  ;;  %p2943_p2 = scmp.lt.s32.totalorder %s2937_s12, %s2937_s12 }
 0x6bf   :  { %2707 = vmatprep.subr.bf16.mxu0 %v3046_v18  ;;  %2739 = vmatprep.subr.bf16.mxu1 %v3242_v28  ;;  %v3679_v9 = vsel %vm2013_vm7, %v3626_v12, %v1974_v61  ;;  %v1978_v13 = vrot.slane %v1881_v8, %v3449_v47  ;;  %v2030_v61 = vld [vmem:[%s3804_s3 + $0x40] sm:$0xff]  ;;  %v2031_v8 = vld [vmem:[%s3804_s3 + $0x48] sm:$0xff] }
 0x6c0   :  { %p2944_p3 = por %p2943_p2, %p2942_p1 }
 0x6c1   :  { %v3683_v19 = vsel %vm2013_vm7, %v3630_v53, %v1978_v13  ;;  %v2032_v13 = vld [vmem:[%s3804_s3 + $0x50] sm:$0xff] }
 0x6c2   :  { %2709 = vmatpush1.bf16.msra.mxu0 %v3061_v23  ;;  %2741 = vmatpush1.bf16.msra.mxu1 %v3258_v33  ;;  %p2945_p4 = pnand %p2944_p3, %p2938_p0 }
 0x6c3   :  { %2711 = vmatprep.subr.bf16.mxu0 %v3070_v26  ;;  %2743 = vmatprep.subr.bf16.mxu1 %v3262_v34 }
 0x6c6   :  { %2713 = vmatpush1.bf16.msra.mxu0 %v3094_v36  ;;  %2745 = vmatpush1.bf16.msra.mxu1 %v3277_v41 }
 0x6c7   :  { %2715 = vmatprep.subr.bf16.mxu0 %v3100_v38  ;;  %2747 = vmatprep.subr.bf16.mxu1 %v3280_v42 }
 0x6ca   :  { %2717 = vmatpush1.bf16.msra.mxu0 %v3115_v44  ;;  %2749 = vmatpush1.bf16.msra.mxu1 %v3295_v49 }
 0x6cb   :  { %2719 = vmatprep.subr.bf16.mxu0 %v3118_v45  ;;  %2751 = vmatprep.subr.bf16.mxu1 %v3298_v52  ;;  %v1543_v52 = vrot.slane %v3661_v54, 6  ;;  %v2762_v54 = vpack.c.bf16 %v2023_v40, %v2022_v15 }
 0x6ce   :  { %2721 = vmatpush1.bf16.msra.mxu0 %v3133_v50  ;;  %2753 = vmatpush1.bf16.msra.mxu1 %v3313_v59 }
 0x6cf   :  { %2723 = vmatprep.subr.bf16.mxu0 %v3136_v51  ;;  %2755 = vmatprep.subr.bf16.mxu1 %v3316_v62 }
 0x6d2   :  { %2725 = vmatpush1.bf16.msra.mxu0 %v3151_v56  ;;  %2757 = vmatpush1.bf16.msra.mxu1 %v3331_v3 }
 0x6d3   :  { %2727 = vmatprep.subr.bf16.mxu0 %v3154_v57  ;;  %2759 = vmatprep.subr.bf16.mxu1 %v3334_v4 }
 0x6d6   :  { %2729 = vmatpush1.bf16.msra.mxu0 %v3163_v60  ;;  %2761 = vmatpush1.bf16.msra.mxu1 %v3343_v11 }
 0x6d7   :  { %2763 = vmatprep.subr.bf16.mxu0 %v2762_v54 }
 0x78c   :  { %v1431_v7 = vpop.f32.mrb[12].mxu0  ;;  %v1502_v17 = vpop.f32.mrb[20].mxu1 }
 0x78d   :  { %v1511_v18 = vrot.slane %v1431_v7, 4  ;;  %v1513_v23 = vrot.slane %v1502_v17, 4  ;;  %v1433_v26 = vpop.f32.mrb[13].mxu0  ;;  %v1504_v36 = vpop.f32.mrb[21].mxu1  ;;  %v2034_v17 = vld [vmem:[%s3804_s3 + $0x60] sm:$0xff] }
 0x78e   :  { %v1512_v38 = vrot.slane %v1433_v26, 4  ;;  %v1514_v44 = vrot.slane %v1504_v36, 4  ;;  %v2036_v26 = vld [vmem:[%s3804_s3 + $0x70] sm:$0xff]  ;;  %v2037_v36 = vld [vmem:[%s3804_s3 + $0x78] sm:$0xff] }
 0x78f   :  { %v1519_v45 = vadd.f32 %v1511_v18, %v3372_v24  ;;  %v1521_v50 = vadd.f32 %v1513_v23, %v3380_v31  ;;  %v2035_v18 = vld [vmem:[%s3804_s3 + $0x68] sm:$0xff] }
 0x790   :  { %v1520_v51 = vadd.f32 %v1512_v38, %v3374_v25  ;;  %v1522_v56 = vadd.f32 %v1514_v44, %v3382_v32  ;;  %v2786_v23 = vpack.c.bf16 %v2035_v18, %v2034_v17  ;;  %v2790_v38 = vpack.c.bf16 %v2037_v36, %v2036_v26 }
 0x791   :  { %v2182_v57 = vmul.f32 -1.442695, %v1519_v45 }
 0x792   :  { %v2183_v60 = vmul.f32 -1.442695, %v1520_v51  ;;  %v2184_v20 = vmul.f32 -1.442695, %v1522_v56 }
 0x793   :  { %2897 = vpow2.f32 %v2182_v57 }
 0x794   :  { %2899 = vpow2.f32 %v2183_v60 }
 0x795   :  { %2901 = vpow2.f32 %v2184_v20 }
 0x796   :  { %2903 = vtanh.f32 %v1521_v50 }
 0x79d   :  { %v2898_v27 = vpop.eup %2897 }
 0x79e   :  { %v2900_v28 = vpop.eup %2899  ;;  %v1526_v33 = vadd.f32 1.0, %v2898_v27 }
 0x79f   :  { %v1532_v34 = vadd.f32 1.0, %v2900_v28  ;;  %v2902_v41 = vpop.eup %2901 }
 0x7a0   :  { %2905 = vrcp.f32 %v1526_v33  ;;  %v2904_v42 = vpop.eup %2903  ;;  %v1539_v3 = vadd.f32 1.0, %v2902_v41 }
 0x7a1   :  { %2907 = vrcp.f32 %v1532_v34 }
 0x7a2   :  { %2909 = vrcp.f32 %v1539_v3 }
 0x7aa   :  { %v2906_v49 = vpop.eup %2905 }
 0x7ab   :  { %v2908_v59 = vpop.eup %2907  ;;  %v1546_v62 = vmul.f32 %v2906_v49, %v2904_v42 }
 0x7ac   :  { %v1545_v4 = vmul.f32 %v2908_v59, %v1543_v52  ;;  %v2910_v12 = vpop.eup %2909 }
 0x7ae   :  { %v3712_v11 = vadd.f32 %v1546_v62, %v1545_v4 }
 0x7b0   :  { %2911 = vtanh.f32 %v3712_v11 }
 0x7ba   :  { %v2912_v53 = vpop.eup %2911 }
 0x7bb   :  { %v1549_v5 = vmul.f32 %v2912_v53, %v2910_v12 }
 0x7bd   :  { %v1551_v1 = vrot.slane %v1549_v5, 4  ;;  %v1882_v21 = vcombine.high %v1549_v5, %v1549_v5 }
 0x7bf   :  { %1618 = vmatmul.mubr.f32.vlgmr.msra.gmra.mrb[14].mxu0 %v1551_v1  ;;  %1689 = vmatmul.mubr.f32.vlgmr.msra.gmra.mrb[22].mxu1 %v1551_v1  ;;  %v1889_v29 = vrot.slane %v1882_v21, %v3393_v39 }
 0x7c0   :  { %2765 = vmatpush3.bf16.msra.mxu0 %v2762_v54 }
 0x7c1   :  { %v1897_v6 = vrot.slane %v1889_v29, %v3393_v39  ;;  %v1890_v37 = vcombine.high %v1889_v29, %v1889_v29  ;;  %2767 = vmatprep.subr.bf16.mxu0 %v2766_v35 }
 0x7c3   :  { %v1984_v30 = vrot.slane %v1897_v6, %v3449_v47  ;;  %v1904_v14 = vrot.slane %v1890_v37, %v3393_v39 }
 0x7c4   :  { %2769 = vmatpush3.bf16.msra.mxu0 %v2766_v35 }
 0x7c5   :  { %v3720_v16 = vsel %vm2016_vm8, %v3679_v9, %v1984_v30  ;;  %v1988_v10 = vrot.slane %v1904_v14, %v3449_v47  ;;  %2771 = vmatprep.subr.bf16.mxu0 %v2770_v2  ;;  %v2778_v9 = vpack.c.bf16 %v2031_v8, %v2030_v61 }
 0x7c7   :  { %v3724_v48 = vsel %vm2016_vm8, %v3683_v19, %v1988_v10  ;;  %v2033_v19 = vld [vmem:[%s3804_s3 + $0x58] sm:$0xff] }
 0x7c8   :  { %2773 = vmatpush3.bf16.msra.mxu0 %v2770_v2  ;;  %v2782_v7 = vpack.c.bf16 %v2033_v19, %v2032_v13 }
 0x7c9   :  { %2775 = vmatprep.subr.bf16.mxu0 %v2774_v0 }
 0x7cc   :  { %2777 = vmatpush3.bf16.msra.mxu0 %v2774_v0 }
 0x7cd   :  { %2779 = vmatprep.subr.bf16.mxu0 %v2778_v9 }
 0x7d0   :  { %2781 = vmatpush3.bf16.msra.mxu0 %v2778_v9 }
 0x7d1   :  { %2783 = vmatprep.subr.bf16.mxu0 %v2782_v7 }
 0x7d4   :  { %2785 = vmatpush3.bf16.msra.mxu0 %v2782_v7 }
 0x7d5   :  { %2787 = vmatprep.subr.bf16.mxu0 %v2786_v23 }
 0x7d8   :  { %2789 = vmatpush3.bf16.msra.mxu0 %v2786_v23 }
 0x7d9   :  { %2791 = vmatprep.subr.bf16.mxu0 %v2790_v38 }
 0x7dc   :  { %2793 = vmatpush3.bf16.msra.mxu0 %v2790_v38 }
 0x892   :  { %v1619_v44 = vpop.f32.mrb[14].mxu0  ;;  %v1690_v45 = vpop.f32.mrb[22].mxu1 }
 0x893   :  { %v1699_v50 = vrot.slane %v1619_v44, 2  ;;  %v1701_v51 = vrot.slane %v1690_v45, 2  ;;  %v1621_v56 = vpop.f32.mrb[15].mxu0  ;;  %v1692_v57 = vpop.f32.mrb[23].mxu1 }
 0x894   :  { %v1700_v60 = vrot.slane %v1621_v56, 2  ;;  %v1702_v20 = vrot.slane %v1692_v57, 2 }
 0x895   :  { %v1707_v27 = vadd.f32 %v1699_v50, %v3372_v24  ;;  %v1709_v28 = vadd.f32 %v1701_v51, %v3380_v31 }
 0x896   :  { %v1708_v33 = vadd.f32 %v1700_v60, %v3374_v25  ;;  %v1710_v34 = vadd.f32 %v1702_v20, %v3382_v32  ;;  %v1731_v25 = vrot.slane %v3712_v11, 6 }
 0x897   :  { %v2185_v41 = vmul.f32 -1.442695, %v1707_v27 }
 0x898   :  { %v2186_v42 = vmul.f32 -1.442695, %v1708_v33  ;;  %v2187_v49 = vmul.f32 -1.442695, %v1710_v34 }
 0x899   :  { %2913 = vpow2.f32 %v2185_v41 }
 0x89a   :  { %2915 = vpow2.f32 %v2186_v42 }
 0x89b   :  { %2917 = vpow2.f32 %v2187_v49 }
 0x89c   :  { %2919 = vtanh.f32 %v1709_v28 }
 0x8a3   :  { %v2914_v52 = vpop.eup %2913 }
 0x8a4   :  { %v2916_v59 = vpop.eup %2915  ;;  %v1714_v62 = vadd.f32 1.0, %v2914_v52 }
 0x8a5   :  { %v1720_v3 = vadd.f32 1.0, %v2916_v59  ;;  %v2918_v24 = vpop.eup %2917 }
 0x8a6   :  { %2921 = vrcp.f32 %v1714_v62  ;;  %v2920_v4 = vpop.eup %2919  ;;  %v1727_v53 = vadd.f32 1.0, %v2918_v24 }
 0x8a7   :  { %2923 = vrcp.f32 %v1720_v3 }
 0x8a8   :  { %2925 = vrcp.f32 %v1727_v53 }
 0x8b0   :  { %v2922_v31 = vpop.eup %2921 }
 0x8b1   :  { %v2924_v12 = vpop.eup %2923  ;;  %v1734_v32 = vmul.f32 %v2922_v31, %v2920_v4 }
 0x8b2   :  { %v1733_v5 = vmul.f32 %v2924_v12, %v1731_v25  ;;  %v2926_v21 = vpop.eup %2925 }
 0x8b4   :  { %v1735_v1 = vadd.f32 %v1734_v32, %v1733_v5 }
 0x8b6   :  { %2927 = vtanh.f32 %v1735_v1 }
 0x8c0   :  { %v2928_v29 = vpop.eup %2927 }
 0x8c1   :  { %v1737_v6 = vmul.f32 %v2928_v29, %v2926_v21 }
 0x8c3   :  { %v1906_v37 = vcombine.high %v1737_v6, %v1737_v6 }
 0x8c5   :  { %v1913_v30 = vrot.slane %v1906_v37, %v3393_v39 }
 0x8c7   :  { %v1921_v14 = vrot.slane %v1913_v30, %v3393_v39  ;;  %v1914_v10 = vcombine.high %v1913_v30, %v1913_v30 }
 0x8c9   :  { %v1929_v15 = vcombine.high %v1921_v14, %v1921_v14  ;;  %v1928_v40 = vrot.slane %v1914_v10, %v3393_v39 }
 0x8cb   :  { %v1994_v11 = vrot.slane %v1929_v15, %v3449_v47  ;;  %v1930_v54 = vcombine.high %v1928_v40, %v1928_v40 }
 0x8cd   :  { %v2020_v55 = vsel %vm2019_vm9, %v3720_v16, %v1994_v11  ;;  %v1998_v43 = vrot.slane %v1930_v54, %v3449_v47 }
 0x8ce   :  { %2239 = vmatprep.mubr.f32.mxu0 %v2020_v55 }
 0x8cf   :  { %v2021_v35 = vsel %vm2019_vm9, %v3724_v48, %v1998_v43 }
 0x8d0   :  { %2240 = vmatmul.mubr.f32.vlgmr.msra.gmra.mrb[16].mxu0 %v2021_v35 }
 0x9a3   :  { %v2241_v63 = vpop.f32.mrb[16].mxu0 }
 0x9a4   :  { %v2111_v58 = vpop.f32.mrb[17].mxu0  ;;  %v2117_v39 = vadd.f32 %v2241_v63, %v2188_v22 }
 0x9a5   :  { %v2112_v2 = vadd.f32 %v2188_v22, %v2111_v58 }
 0x9a7   :  { %2120 = vmax.xlane.f32.xlu1 %v2112_v2 }
 0x9ab   :  { %2122 = vmax.xlane.f32.xlu1 %v2117_v39 }
 0xa34   :  { %v2121_v46 = vpop.xlane.xlu1 %2120 }
 0xa35   :  { %v2124_v0 = vsub.f32 %v2112_v2, %v2121_v46 }
 0xa37   :  { %v2126_v61 = vmul.f32 1.442695, %v2124_v0 }
 0xa38   :  { %v2123_v16 = vpop.xlane.xlu1 %2122 }
 0xa39   :  { %2929 = vpow2.f32 %v2126_v61  ;;  %v2125_v47 = vsub.f32 %v2117_v39, %v2123_v16 }
 0xa3b   :  { %v2128_v8 = vmul.f32 1.442695, %v2125_v47 }
 0xa3d   :  { %2931 = vpow2.f32 %v2128_v8 }
 0xa43   :  { %v2930_v48 = vpop.eup %2929 }
 0xa44   :  { %2130 = vadd.xlane.f32.xlu0 %v2930_v48 }
 0xa47   :  { %v2932_v9 = vpop.eup %2931 }
 0xa48   :  { %2132 = vadd.xlane.f32.xlu1 %v2932_v9 }
 0xad1   :  { %v2131_v13 = vpop.xlane.xlu0 %2130 }
 0xad2   :  { %2933 = vlog2.f32 %v2131_v13 }
 0xad5   :  { %v2133_v19 = vpop.xlane.xlu1 %2132 }
 0xad6   :  { %2935 = vlog2.f32 %v2133_v19 }
 0xadc   :  { %v2934_v7 = vpop.eup %2933 }
 0xadd   :  { %v2135_v17 = vmul.f32 0.6931472, %v2934_v7 }
 0xadf   :  { %v2138_v18 = vsub.f32 %v2124_v0, %v2135_v17 }
 0xae0   :  { %v2936_v23 = vpop.eup %2935 }
 0xae1   :  { %2140 = vst [vmem:[#allocation2] sm:$0xff] %v2138_v18  ;;  %v2137_v26 = vmul.f32 0.6931472, %v2936_v23 }
 0xae3   :  { %v2139_v36 = vsub.f32 %v2125_v47, %v2137_v26 }
 0xae5   :  { %2141 = vst [vmem:[#allocation2 + $0x8] sm:$0xff] %v2139_v36 }
 0xae6   :  { %2948 = shalt.err (!%p2945_p4)
}
 0xae7   :  { %s2949_s15 = scalar_lea.hbm %s3806_s5, 256 }
 0xae8   :  { %p2950_p5 = scmp.ne.s32.totalorder %s3806_s5, %s2949_s15  ;;  %p2953_p6 = scmp.lt.u32.totalorder %s2949_s15, %s3806_s5 }
 0xaea   :  { %p2955_p7 = pnand %p2953_p6, %p2950_p5 }
 0xaec   :  { %2958 = shalt.err (!%p2955_p7)
}
 0xaed   :  { %s2965_s20 = smov 128   ;;  %s2966_s21 = smov 8  }
 0xaee   :  { %2153 = dma.vmem_to_hbm [thread:$0]  %s2148_s11, 256, %s3806_s5, [#allocation3], %s2965_s20, %s2965_s20, %s2966_s21  }
 0xaef   :  { %2959 = dma.done.wait [#allocation3], 256  }
 0xaf0   :  { %2960 = vsyncadd [#allocation3], 4294967040 }
 0xaf1   :  { %2157 = vsyncpa [#allocation3], 1 }

</bundles_post_ra>
